<compile_context>
chip_gen: v6e
topology: v6e:2x2x1
jax: 0.10.0
libtpu: 0.0.40
codegen_flags: <defaults>
</compile_context>

<pallas_src>
import functools

import jax
import jax.numpy as jnp
from jax.experimental import pallas as pl
from jax.experimental.pallas import tpu as pltpu

INPUT_SIZE = 784          # the module hard-codes x.view(-1, 784)
LATENT_DIM = 32
H1 = 256
H2 = 512
HEAD = 2 * LATENT_DIM     # fused mu | logvar head width (64)
HEAD_PAD = 128            # lane-dense padded head width


def _round_up(n, m):
    return ((n + m - 1) // m) * m


def vae_kernel(x_ref, eps_ref,
               w1_ref, b1_ref, w2_ref, b2_ref,
               wh_ref, bh_ref,
               wd1_ref, bd1_ref, wd2_ref, bd2_ref,
               recon_ref, head_ref):
    """One batch tile of the full VAE forward. All dots accumulate in f32 on the MXU."""
    cd = w1_ref.dtype                                                   # matmul input dtype (bf16)

    x = x_ref[...]                                                      # [TB, 784] bf16

    # backbone: Linear(784, 256) + LeakyReLU(0.01), Linear(256, 512) + ReLU
    h = jnp.dot(x, w1_ref[...], preferred_element_type=jnp.float32) + b1_ref[...]
    h = jnp.where(h > 0, h, 0.01 * h)                                   # LeakyReLU default slope
    f = jnp.dot(h.astype(cd), w2_ref[...], preferred_element_type=jnp.float32) + b2_ref[...]
    f = jnp.maximum(f, 0.0)                                             # ReLU

    # fused heads: one [512, 128] matmul (mu | logvar | zero-pad) -> lane-dense store
    head = jnp.dot(f.astype(cd), wh_ref[...], preferred_element_type=jnp.float32) + bh_ref[...]
    mu = head[:, :LATENT_DIM]
    logvar = head[:, LATENT_DIM:HEAD]

    # reparametrize: z = eps * exp(0.5 * logvar) + mu   (eps supplied from host RNG)
    z = eps_ref[...] * jnp.exp(0.5 * logvar) + mu

    # decoder: Linear(latent, 256) + ReLU, Linear(256, 784) + Sigmoid
    d = jnp.dot(z.astype(cd), wd1_ref[...], preferred_element_type=jnp.float32) + bd1_ref[...]
    d = jnp.maximum(d, 0.0)
    o = jnp.dot(d.astype(cd), wd2_ref[...], preferred_element_type=jnp.float32) + bd2_ref[...]

    recon_ref[...] = jax.nn.sigmoid(o).astype(recon_ref.dtype)          # bf16 store (halves HBM out)
    head_ref[...] = head                                                # f32, 128-wide lane-dense


@functools.partial(jax.jit, static_argnames=("max_tile", "compute_dtype"))
def vae_forward(x_nchw, eps, params, *, max_tile=1024, compute_dtype=jnp.bfloat16):
    """x_nchw: [B, 1, 28, 28] f32. eps: [B, latent_dim] f32.

    Returns (recon[B,784] bf16, mu[B,32] f32, logvar[B,32] f32)."""
    B = x_nchw.shape[0]
    cd = compute_dtype

    # Batch tile: multiple of 16 rows (bf16 sublane packing), capped at max_tile,
    # and sized so that there are >= 2 grid steps whenever B > 16 (v7x megacore).
    b16 = _round_up(B, 16)
    tb_target = _round_up(pl.cdiv(b16, 2), 16)
    tb = max(16, min(max_tile, tb_target))
    b_pad = _round_up(B, tb)

    # glue: x.view(-1, 784); pad only the batch rows (feature dim stays 784).
    x = x_nchw.reshape(B, INPUT_SIZE).astype(cd)
    x = jnp.pad(x, ((0, b_pad - B), (0, 0)))
    eps_p = jnp.pad(eps.astype(jnp.float32), ((0, b_pad - B), (0, 0)))

    # weight prep: bf16 matmul operands, f32 biases; fused mu/logvar head padded to 128 cols.
    w1 = params["w1"].astype(cd)
    b1 = params["b1"].astype(jnp.float32)
    w2 = params["w2"].astype(cd)
    b2 = params["b2"].astype(jnp.float32)
    wh = jnp.pad(jnp.concatenate([params["wm"], params["ws"]], axis=1).astype(cd),
                 ((0, 0), (0, HEAD_PAD - HEAD)))
    bh = jnp.pad(jnp.concatenate([params["bm"], params["bs"]], axis=1).astype(jnp.float32),
                 ((0, 0), (0, HEAD_PAD - HEAD)))
    wd1 = params["wd1"].astype(cd)
    bd1 = params["bd1"].astype(jnp.float32)
    wd2 = params["wd2"].astype(cd)
    bd2 = params["bd2"].astype(jnp.float32)

    grid = (b_pad // tb,)

    def act_spec(cols):                       # batch-tiled, auto double-buffered
        return pl.BlockSpec((tb, cols), lambda i: (i, 0))

    def resident(a):                          # same block every step -> stays VMEM-resident
        return pl.BlockSpec(a.shape, lambda i: (0, 0))

    in_specs = [
        act_spec(INPUT_SIZE),                 # x tile (784 == full array dim)
        act_spec(LATENT_DIM),                 # eps tile (32 == full array dim)
        resident(w1), resident(b1), resident(w2), resident(b2),
        resident(wh), resident(bh),
        resident(wd1), resident(bd1), resident(wd2), resident(bd2),
    ]
    out_specs = (act_spec(INPUT_SIZE), act_spec(HEAD_PAD))
    out_shapes = (
        jax.ShapeDtypeStruct((b_pad, INPUT_SIZE), cd),           # recon (bf16, final width)
        jax.ShapeDtypeStruct((b_pad, HEAD_PAD), jnp.float32),    # mu | logvar | pad
    )

    recon_p, head_p = pl.pallas_call(
        vae_kernel,
        grid=grid,
        in_specs=in_specs,
        out_specs=out_specs,
        out_shape=out_shapes,
        compiler_params=pltpu.CompilerParams(
            dimension_semantics=("parallel",),   # independent batch tiles (v7x: 2 TCs)
            vmem_limit_bytes=32 << 20,           # ~16 MiB working set at tb=1024 incl. buffers
        ),
    )(x, eps_p, w1, b1, w2, b2, wh, bh, wd1, bd1, wd2, bd2)

    recon = recon_p[:B]                          # bf16; caller upcasts if f32 needed
    mu = head_p[:B, :LATENT_DIM]
    logvar = head_p[:B, LATENT_DIM:HEAD]
    return recon, mu, logvar


def _linear_params(key, fan_in, fan_out):
    """Deterministic init mimicking nn.Linear: U(-1/sqrt(fan_in), 1/sqrt(fan_in)).
    Weight stored as [in, out] so the kernel computes x @ W + b."""
    kw, kb = jax.random.split(key)
    bound = 1.0 / jnp.sqrt(jnp.float32(fan_in))
    w = jax.random.uniform(kw, (fan_in, fan_out), jnp.float32, -bound, bound)
    b = jax.random.uniform(kb, (1, fan_out), jnp.float32, -bound, bound)
    return w, b


def make_params(key):
    keys = jax.random.split(key, 6)
    w1, b1 = _linear_params(keys[0], INPUT_SIZE, H1)
    w2, b2 = _linear_params(keys[1], H1, H2)
    wm, bm = _linear_params(keys[2], H2, LATENT_DIM)
    ws, bs = _linear_params(keys[3], H2, LATENT_DIM)
    wd1, bd1 = _linear_params(keys[4], LATENT_DIM, H1)
    wd2, bd2 = _linear_params(keys[5], H1, INPUT_SIZE)
    return dict(w1=w1, b1=b1, w2=w2, b2=b2, wm=wm, bm=bm, ws=ws, bs=bs,
                wd1=wd1, bd1=bd1, wd2=wd2, bd2=bd2)


def _reference(x_nchw, eps, p, compute_dtype=jnp.bfloat16):
    """Pure-JAX reference with the same bf16-input / f32-accumulate matmul math."""
    cd = compute_dtype
    x = x_nchw.reshape(x_nchw.shape[0], INPUT_SIZE).astype(cd)
    h = jnp.dot(x, p["w1"].astype(cd), preferred_element_type=jnp.float32) + p["b1"]
    h = jnp.where(h > 0, h, 0.01 * h)
    f = jnp.maximum(jnp.dot(h.astype(cd), p["w2"].astype(cd),
                            preferred_element_type=jnp.float32) + p["b2"], 0.0)
    mu = jnp.dot(f.astype(cd), p["wm"].astype(cd), preferred_element_type=jnp.float32) + p["bm"]
    logvar = jnp.dot(f.astype(cd), p["ws"].astype(cd), preferred_element_type=jnp.float32) + p["bs"]
    z = eps * jnp.exp(0.5 * logvar) + mu
    d = jnp.maximum(jnp.dot(z.astype(cd), p["wd1"].astype(cd),
                            preferred_element_type=jnp.float32) + p["bd1"], 0.0)
    recon = jax.nn.sigmoid(jnp.dot(d.astype(cd), p["wd2"].astype(cd),
                                   preferred_element_type=jnp.float32) + p["bd2"])
    return recon, mu, logvar


if __name__ == "__main__":
    key = jax.random.PRNGKey(0)
    k_x, k_eps, k_p, k_x2, k_eps2 = jax.random.split(key, 5)

    params = make_params(k_p)

    # Case 1: tiny batch (single 16-row grid tile, 12 padded rows)
    B = 4
    x = jax.random.normal(k_x, (B, 1, 28, 28), jnp.float32)             # NCHW, flattened to 784
    eps = jax.random.normal(k_eps, (B, LATENT_DIM), jnp.float32)        # reparametrization noise
    recon, mu, logvar = vae_forward(x, eps, params)
    jax.block_until_ready((recon, mu, logvar))

    r_ref, mu_r, lv_r = _reference(x, eps, params)
    assert recon.shape == (B, INPUT_SIZE) and mu.shape == (B, LATENT_DIM) and logvar.shape == (B, LATENT_DIM)
    assert jnp.allclose(recon.astype(jnp.float32), r_ref, atol=1e-2), "recon mismatch"
    assert jnp.allclose(mu, mu_r, atol=1e-2), "mu mismatch"
    assert jnp.allclose(logvar, lv_r, atol=1e-2), "logvar mismatch"

    # Case 2: exercise the batch grid (B=20 -> two 16-row tiles with a padded tail)
    B2 = 20
    x2 = jax.random.normal(k_x2, (B2, 1, 28, 28), jnp.float32)
    eps2 = jax.random.normal(k_eps2, (B2, LATENT_DIM), jnp.float32)
    recon2, mu2, logvar2 = vae_forward(x2, eps2, params)
    jax.block_until_ready((recon2, mu2, logvar2))

    r2, m2, l2 = _reference(x2, eps2, params)
    assert jnp.allclose(recon2.astype(jnp.float32), r2, atol=1e-2), "recon mismatch (gridded)"
    assert jnp.allclose(mu2, m2, atol=1e-2), "mu mismatch (gridded)"
    assert jnp.allclose(logvar2, l2, atol=1e-2), "logvar mismatch (gridded)"

    print("KERNEL_OK")
</pallas_src>

<mosaic_0001>
module attributes {stable_mosaic.version = 11 : i64} {
  func.func @vae_kernel(%arg0: i32, %arg1: memref<16x784xbf16, #tpu.memory_space<vmem>>, %arg2: memref<16x32xf32, #tpu.memory_space<vmem>>, %arg3: memref<784x256xbf16, #tpu.memory_space<vmem>>, %arg4: memref<1x256xf32, #tpu.memory_space<vmem>>, %arg5: memref<256x512xbf16, #tpu.memory_space<vmem>>, %arg6: memref<1x512xf32, #tpu.memory_space<vmem>>, %arg7: memref<512x128xbf16, #tpu.memory_space<vmem>>, %arg8: memref<1x128xf32, #tpu.memory_space<vmem>>, %arg9: memref<32x256xbf16, #tpu.memory_space<vmem>>, %arg10: memref<1x256xf32, #tpu.memory_space<vmem>>, %arg11: memref<256x784xbf16, #tpu.memory_space<vmem>>, %arg12: memref<1x784xf32, #tpu.memory_space<vmem>>, %arg13: memref<16x784xbf16, #tpu.memory_space<vmem>>, %arg14: memref<16x128xf32, #tpu.memory_space<vmem>>) attributes {dimension_semantics = [#tpu.dimension_semantics<parallel>], iteration_bounds = array<i64: 1>, scalar_prefetch = 0 : i64, scratch_operands = 0 : i64, tpu.core_type = #tpu.core_type<tc>, window_params = [{transform_indices = @transform_0, window_bounds = array<i64: 16, 784>}, {transform_indices = @transform_1, window_bounds = array<i64: 16, 32>}, {pipeline_mode = #tpu.pipeline_mode<synchronous>, transform_indices = @transform_2, window_bounds = array<i64: 784, 256>}, {pipeline_mode = #tpu.pipeline_mode<synchronous>, transform_indices = @transform_3, window_bounds = array<i64: 1, 256>}, {pipeline_mode = #tpu.pipeline_mode<synchronous>, transform_indices = @transform_4, window_bounds = array<i64: 256, 512>}, {pipeline_mode = #tpu.pipeline_mode<synchronous>, transform_indices = @transform_5, window_bounds = array<i64: 1, 512>}, {pipeline_mode = #tpu.pipeline_mode<synchronous>, transform_indices = @transform_6, window_bounds = array<i64: 512, 128>}, {pipeline_mode = #tpu.pipeline_mode<synchronous>, transform_indices = @transform_7, window_bounds = array<i64: 1, 128>}, {pipeline_mode = #tpu.pipeline_mode<synchronous>, transform_indices = @transform_8, window_bounds = array<i64: 32, 256>}, {pipeline_mode = #tpu.pipeline_mode<synchronous>, transform_indices = @transform_9, window_bounds = array<i64: 1, 256>}, {pipeline_mode = #tpu.pipeline_mode<synchronous>, transform_indices = @transform_10, window_bounds = array<i64: 256, 784>}, {pipeline_mode = #tpu.pipeline_mode<synchronous>, transform_indices = @transform_11, window_bounds = array<i64: 1, 784>}, {transform_indices = @transform_12, window_bounds = array<i64: 16, 784>}, {transform_indices = @transform_13, window_bounds = array<i64: 16, 128>}]} {
    %c0 = arith.constant 0 : index
    %c0_0 = arith.constant 0 : index
    %0 = vector.load %arg1[%c0, %c0_0] : memref<16x784xbf16, #tpu.memory_space<vmem>>, vector<16x784xbf16>
    %c0_1 = arith.constant 0 : index
    %c0_2 = arith.constant 0 : index
    %1 = vector.load %arg3[%c0_1, %c0_2] : memref<784x256xbf16, #tpu.memory_space<vmem>>, vector<784x256xbf16>
    %cst = arith.constant dense<0.000000e+00> : vector<16x256xf32>
    %2 = tpu.matmul %0, %1, %cst {dimension_numbers = #tpu.dot_dimension_numbers<[1], [0], [0], [1], [0, 0, 1, 1], [], []>} : vector<16x784xbf16>, vector<784x256xbf16>, vector<16x256xf32> -> vector<16x256xf32>
    %c0_3 = arith.constant 0 : index
    %c0_4 = arith.constant 0 : index
    %3 = vector.load %arg4[%c0_3, %c0_4] : memref<1x256xf32, #tpu.memory_space<vmem>>, vector<1x256xf32>
    %4 = vector.broadcast %3 : vector<1x256xf32> to vector<16x256xf32>
    %5 = arith.addf %2, %4 : vector<16x256xf32>
    %cst_5 = arith.constant 0.000000e+00 : f32
    %6 = vector.broadcast %cst_5 : f32 to vector<16x256xf32>
    %7 = arith.cmpf ogt, %5, %6 : vector<16x256xf32>
    %cst_6 = arith.constant 0.00999999977 : f32
    %8 = vector.broadcast %cst_6 : f32 to vector<16x256xf32>
    %9 = arith.mulf %8, %5 : vector<16x256xf32>
    %10 = arith.select %7, %5, %9 : vector<16x256xi1>, vector<16x256xf32>
    %11 = arith.truncf %10 : vector<16x256xf32> to vector<16x256xbf16>
    %c0_7 = arith.constant 0 : index
    %c0_8 = arith.constant 0 : index
    %12 = vector.load %arg5[%c0_7, %c0_8] : memref<256x512xbf16, #tpu.memory_space<vmem>>, vector<256x512xbf16>
    %cst_9 = arith.constant dense<0.000000e+00> : vector<16x512xf32>
    %13 = tpu.matmul %11, %12, %cst_9 {dimension_numbers = #tpu.dot_dimension_numbers<[1], [0], [0], [1], [0, 0, 1, 1], [], []>} : vector<16x256xbf16>, vector<256x512xbf16>, vector<16x512xf32> -> vector<16x512xf32>
    %c0_10 = arith.constant 0 : index
    %c0_11 = arith.constant 0 : index
    %14 = vector.load %arg6[%c0_10, %c0_11] : memref<1x512xf32, #tpu.memory_space<vmem>>, vector<1x512xf32>
    %15 = vector.broadcast %14 : vector<1x512xf32> to vector<16x512xf32>
    %16 = arith.addf %13, %15 : vector<16x512xf32>
    %cst_12 = arith.constant 0.000000e+00 : f32
    %17 = vector.broadcast %cst_12 : f32 to vector<16x512xf32>
    %18 = arith.maximumf %16, %17 : vector<16x512xf32>
    %19 = arith.truncf %18 : vector<16x512xf32> to vector<16x512xbf16>
    %c0_13 = arith.constant 0 : index
    %c0_14 = arith.constant 0 : index
    %20 = vector.load %arg7[%c0_13, %c0_14] : memref<512x128xbf16, #tpu.memory_space<vmem>>, vector<512x128xbf16>
    %cst_15 = arith.constant dense<0.000000e+00> : vector<16x128xf32>
    %21 = tpu.matmul %19, %20, %cst_15 {dimension_numbers = #tpu.dot_dimension_numbers<[1], [0], [0], [1], [0, 0, 1, 1], [], []>} : vector<16x512xbf16>, vector<512x128xbf16>, vector<16x128xf32> -> vector<16x128xf32>
    %c0_16 = arith.constant 0 : index
    %c0_17 = arith.constant 0 : index
    %22 = vector.load %arg8[%c0_16, %c0_17] : memref<1x128xf32, #tpu.memory_space<vmem>>, vector<1x128xf32>
    %23 = vector.broadcast %22 : vector<1x128xf32> to vector<16x128xf32>
    %24 = arith.addf %21, %23 : vector<16x128xf32>
    %25 = vector.extract_strided_slice %24 {offsets = [0, 0], sizes = [16, 32], strides = [1, 1]} : vector<16x128xf32> to vector<16x32xf32>
    %26 = vector.extract_strided_slice %24 {offsets = [0, 32], sizes = [16, 32], strides = [1, 1]} : vector<16x128xf32> to vector<16x32xf32>
    %c0_18 = arith.constant 0 : index
    %c0_19 = arith.constant 0 : index
    %27 = vector.load %arg2[%c0_18, %c0_19] : memref<16x32xf32, #tpu.memory_space<vmem>>, vector<16x32xf32>
    %cst_20 = arith.constant 5.000000e-01 : f32
    %28 = vector.broadcast %cst_20 : f32 to vector<16x32xf32>
    %29 = arith.mulf %28, %26 : vector<16x32xf32>
    %30 = math.exp %29 : vector<16x32xf32>
    %31 = arith.mulf %27, %30 : vector<16x32xf32>
    %32 = arith.addf %31, %25 : vector<16x32xf32>
    %33 = arith.truncf %32 : vector<16x32xf32> to vector<16x32xbf16>
    %c0_21 = arith.constant 0 : index
    %c0_22 = arith.constant 0 : index
    %34 = vector.load %arg9[%c0_21, %c0_22] : memref<32x256xbf16, #tpu.memory_space<vmem>>, vector<32x256xbf16>
    %cst_23 = arith.constant dense<0.000000e+00> : vector<16x256xf32>
    %35 = tpu.matmul %33, %34, %cst_23 {dimension_numbers = #tpu.dot_dimension_numbers<[1], [0], [0], [1], [0, 0, 1, 1], [], []>} : vector<16x32xbf16>, vector<32x256xbf16>, vector<16x256xf32> -> vector<16x256xf32>
    %c0_24 = arith.constant 0 : index
    %c0_25 = arith.constant 0 : index
    %36 = vector.load %arg10[%c0_24, %c0_25] : memref<1x256xf32, #tpu.memory_space<vmem>>, vector<1x256xf32>
    %37 = vector.broadcast %36 : vector<1x256xf32> to vector<16x256xf32>
    %38 = arith.addf %35, %37 : vector<16x256xf32>
    %cst_26 = arith.constant 0.000000e+00 : f32
    %39 = vector.broadcast %cst_26 : f32 to vector<16x256xf32>
    %40 = arith.maximumf %38, %39 : vector<16x256xf32>
    %41 = arith.truncf %40 : vector<16x256xf32> to vector<16x256xbf16>
    %c0_27 = arith.constant 0 : index
    %c0_28 = arith.constant 0 : index
    %42 = vector.load %arg11[%c0_27, %c0_28] : memref<256x784xbf16, #tpu.memory_space<vmem>>, vector<256x784xbf16>
    %cst_29 = arith.constant dense<0.000000e+00> : vector<16x784xf32>
    %43 = tpu.matmul %41, %42, %cst_29 {dimension_numbers = #tpu.dot_dimension_numbers<[1], [0], [0], [1], [0, 0, 1, 1], [], []>} : vector<16x256xbf16>, vector<256x784xbf16>, vector<16x784xf32> -> vector<16x784xf32>
    %c0_30 = arith.constant 0 : index
    %c0_31 = arith.constant 0 : index
    %44 = vector.load %arg12[%c0_30, %c0_31] : memref<1x784xf32, #tpu.memory_space<vmem>>, vector<1x784xf32>
    %45 = vector.broadcast %44 : vector<1x784xf32> to vector<16x784xf32>
    %46 = arith.addf %43, %45 : vector<16x784xf32>
    %47 = arith.negf %46 : vector<16x784xf32>
    %48 = math.exp %47 : vector<16x784xf32>
    %cst_32 = arith.constant 1.000000e+00 : f32
    %49 = vector.broadcast %cst_32 : f32 to vector<16x784xf32>
    %50 = arith.addf %49, %48 : vector<16x784xf32>
    %51 = arith.divf %49, %50 : vector<16x784xf32>
    %52 = arith.truncf %51 : vector<16x784xf32> to vector<16x784xbf16>
    %c0_33 = arith.constant 0 : index
    %c0_34 = arith.constant 0 : index
    %53 = vector.load %arg13[%c0_33, %c0_34] : memref<16x784xbf16, #tpu.memory_space<vmem>>, vector<16x784xbf16>
    tpu.vector_store %arg13[%c0_33, %c0_34], %52 {strides = array<i32>} : memref<16x784xbf16, #tpu.memory_space<vmem>>, vector<16x784xbf16>,
    %c0_35 = arith.constant 0 : index
    %c0_36 = arith.constant 0 : index
    %54 = vector.load %arg14[%c0_35, %c0_36] : memref<16x128xf32, #tpu.memory_space<vmem>>, vector<16x128xf32>
    tpu.vector_store %arg14[%c0_35, %c0_36], %24 {strides = array<i32>} : memref<16x128xf32, #tpu.memory_space<vmem>>, vector<16x128xf32>,
    return
  }
  func.func @transform_0(%arg0: i32) -> (i32, i32) {
    %c0_i32 = arith.constant 0 : i32
    %c0_i32_0 = arith.constant 0 : i32
    return %arg0, %c0_i32 : i32, i32
  }
  func.func @transform_1(%arg0: i32) -> (i32, i32) {
    %c0_i32 = arith.constant 0 : i32
    %c0_i32_0 = arith.constant 0 : i32
    return %arg0, %c0_i32 : i32, i32
  }
  func.func @transform_2(%arg0: i32) -> (i32, i32) {
    %c0_i32 = arith.constant 0 : i32
    %c0_i32_0 = arith.constant 0 : i32
    %c0_i32_1 = arith.constant 0 : i32
    return %c0_i32, %c0_i32_0 : i32, i32
  }
  func.func @transform_3(%arg0: i32) -> (i32, i32) {
    %c0_i32 = arith.constant 0 : i32
    %c0_i32_0 = arith.constant 0 : i32
    %c0_i32_1 = arith.constant 0 : i32
    return %c0_i32, %c0_i32_0 : i32, i32
  }
  func.func @transform_4(%arg0: i32) -> (i32, i32) {
    %c0_i32 = arith.constant 0 : i32
    %c0_i32_0 = arith.constant 0 : i32
    %c0_i32_1 = arith.constant 0 : i32
    return %c0_i32, %c0_i32_0 : i32, i32
  }
  func.func @transform_5(%arg0: i32) -> (i32, i32) {
    %c0_i32 = arith.constant 0 : i32
    %c0_i32_0 = arith.constant 0 : i32
    %c0_i32_1 = arith.constant 0 : i32
    return %c0_i32, %c0_i32_0 : i32, i32
  }
  func.func @transform_6(%arg0: i32) -> (i32, i32) {
    %c0_i32 = arith.constant 0 : i32
    %c0_i32_0 = arith.constant 0 : i32
    %c0_i32_1 = arith.constant 0 : i32
    return %c0_i32, %c0_i32_0 : i32, i32
  }
  func.func @transform_7(%arg0: i32) -> (i32, i32) {
    %c0_i32 = arith.constant 0 : i32
    %c0_i32_0 = arith.constant 0 : i32
    %c0_i32_1 = arith.constant 0 : i32
    return %c0_i32, %c0_i32_0 : i32, i32
  }
  func.func @transform_8(%arg0: i32) -> (i32, i32) {
    %c0_i32 = arith.constant 0 : i32
    %c0_i32_0 = arith.constant 0 : i32
    %c0_i32_1 = arith.constant 0 : i32
    return %c0_i32, %c0_i32_0 : i32, i32
  }
  func.func @transform_9(%arg0: i32) -> (i32, i32) {
    %c0_i32 = arith.constant 0 : i32
    %c0_i32_0 = arith.constant 0 : i32
    %c0_i32_1 = arith.constant 0 : i32
    return %c0_i32, %c0_i32_0 : i32, i32
  }
  func.func @transform_10(%arg0: i32) -> (i32, i32) {
    %c0_i32 = arith.constant 0 : i32
    %c0_i32_0 = arith.constant 0 : i32
    %c0_i32_1 = arith.constant 0 : i32
    return %c0_i32, %c0_i32_0 : i32, i32
  }
  func.func @transform_11(%arg0: i32) -> (i32, i32) {
    %c0_i32 = arith.constant 0 : i32
    %c0_i32_0 = arith.constant 0 : i32
    %c0_i32_1 = arith.constant 0 : i32
    return %c0_i32, %c0_i32_0 : i32, i32
  }
  func.func @transform_12(%arg0: i32) -> (i32, i32) {
    %c0_i32 = arith.constant 0 : i32
    %c0_i32_0 = arith.constant 0 : i32
    return %arg0, %c0_i32 : i32, i32
  }
  func.func @transform_13(%arg0: i32) -> (i32, i32) {
    %c0_i32 = arith.constant 0 : i32
    %c0_i32_0 = arith.constant 0 : i32
    return %arg0, %c0_i32 : i32, i32
  }
}

</mosaic_0001>

<bundles_post_ra>
// kernel: vae_forward.1
= control target key start
LH: loop header
LB: loop body
LE: loop exit
PB: predicated region body
PF: predicated region fallthrough
CT: control target
= control target key end

     0   :  { %vm687_vm0 = vcmask 130048   ;;  %s3824_s22 = smov 96   ;;  %vm1783_vm5 = vcmask 261120   ;;  %vm2878_vm6 = vcmask 125952   ;;  %s4953_s2 = inlined_call_operand.vmem [shape: bf16[784,256], index: 2, kind: input, shape index: {}]   ;;  %s4954_s0 = inlined_call_operand.vmem [shape: bf16[16,784], index: 0, kind: input, shape index: {}]   ;;  %s4955_s4 = inlined_call_operand.vmem [shape: bf16[256,512], index: 4, kind: input, shape index: {}]   ;;  %s4956_s6 = inlined_call_operand.vmem [shape: bf16[512,128], index: 6, kind: input, shape index: {}]   ;;  %s4957_s3 = inlined_call_operand.vmem [shape: f32[1,256], index: 3, kind: input, shape index: {}]   ;;  %s4958_s5 = inlined_call_operand.vmem [shape: f32[1,512], index: 5, kind: input, shape index: {}]   ;;  %s4959_s7 = inlined_call_operand.vmem [shape: f32[1,128], index: 7, kind: input, shape index: {}]   ;;  %s4960_s13 = inlined_call_operand.vmem [shape: f32[16,128], index: 13, kind: output, shape index: {1}]   ;;  %s4961_s8 = inlined_call_operand.vmem [shape: bf16[32,256], index: 8, kind: input, shape index: {}]   ;;  %s4962_s10 = inlined_call_operand.vmem [shape: bf16[256,784], index: 10, kind: input, shape index: {}]   ;;  %s4963_s1 = inlined_call_operand.vmem [shape: f32[16,32], index: 1, kind: input, shape index: {}]   ;;  %s4964_s9 = inlined_call_operand.vmem [shape: f32[1,256], index: 9, kind: input, shape index: {}]   ;;  %s4965_s11 = inlined_call_operand.vmem [shape: f32[1,784], index: 11, kind: input, shape index: {}]   ;;  %s4966_s12 = inlined_call_operand.vmem [shape: bf16[16,784], index: 12, kind: output, shape index: {0}]  }
   0x1   :  { %v3312_v0 = vld [vmem:[%s4953_s2 + $0x74] ss:$8 sps:$4 sm:$0xff]   ;;  %v3314_v1 = vld [vmem:[%s4953_s2 + $0x70] ss:$8 sps:$4 sm:$0xff]   ;;  %v3318_v4 = vld [vmem:[%s4953_s2 + $0x64] ss:$8 sps:$4 sm:$0xff]  }
   0x2   :  { %691 = vmatprep.subr.bf16.mxu0 %v3312_v0  ;;  %v3315_v2 = vld [vmem:[%s4953_s2 + $0x174] ss:$8 sps:$4 sm:$0xff]   ;;  %v3317_v3 = vld [vmem:[%s4953_s2 + $0x170] ss:$8 sps:$4 sm:$0xff]   ;;  %v3320_v5 = vld [vmem:[%s4953_s2 + $0x60] ss:$8 sps:$4 sm:$0xff]  }
   0x3   :  { %692 = vmatpush1.bf16.msra.mxu0 %v3314_v1  ;;  %734 = vmatprep.subr.bf16.mxu1 %v3315_v2  ;;  %v3321_v6 = vld [vmem:[%s4953_s2 + $0x164] ss:$8 sps:$4 sm:$0xff]   ;;  %v3323_v7 = vld [vmem:[%s4953_s2 + $0x160] ss:$8 sps:$4 sm:$0xff]   ;;  %v3324_v8 = vld [vmem:[%s4953_s2 + $0x54] ss:$8 sps:$4 sm:$0xff]  }
   0x4   :  { %735 = vmatpush1.bf16.msra.mxu1 %v3317_v3  ;;  %693 = vmatprep.subr.bf16.mxu0 %v3318_v4  ;;  %v3326_v9 = vld [vmem:[%s4953_s2 + $0x50] ss:$8 sps:$4 sm:$0xff]   ;;  %v3327_v10 = vld [vmem:[%s4953_s2 + $0x154] ss:$8 sps:$4 sm:$0xff]   ;;  %v3330_v11 = vld [vmem:[%s4953_s2 + $0x44] ss:$8 sps:$4 sm:$0xff]  }
   0x5   :  { %736 = vmatprep.subr.bf16.mxu1 %v3321_v6  ;;  %v3329_v12 = vld [vmem:[%s4953_s2 + $0x150] ss:$8 sps:$4 sm:$0xff]   ;;  %v3333_v13 = vld [vmem:[%s4953_s2 + $0x144] ss:$8 sps:$4 sm:$0xff]   ;;  %v3332_v14 = vld [vmem:[%s4953_s2 + $0x40] ss:$8 sps:$4 sm:$0xff]  }
   0x6   :  { %v3336_v15 = vld [vmem:[%s4953_s2 + $0x34] ss:$8 sps:$4 sm:$0xff]   ;;  %v3335_v16 = vld [vmem:[%s4953_s2 + $0x140] ss:$8 sps:$4 sm:$0xff]   ;;  %v3338_v18 = vld [vmem:[%s4953_s2 + $0x30] ss:$8 sps:$4 sm:$0xff]  }
   0x7   :  { %694 = vmatpush1.bf16.msra.mxu0 %v3320_v5  ;;  %v3339_v17 = vld [vmem:[%s4953_s2 + $0x134] ss:$8 sps:$4 sm:$0xff]   ;;  %v3342_v19 = vld [vmem:[%s4953_s2 + $0x24] ss:$8 sps:$4 sm:$0xff]   ;;  %v3341_v20 = vld [vmem:[%s4953_s2 + $0x130] ss:$8 sps:$4 sm:$0xff]  }
   0x8   :  { %695 = vmatprep.subr.bf16.mxu0 %v3324_v8  ;;  %737 = vmatpush1.bf16.msra.mxu1 %v3323_v7  ;;  %v3345_v21 = vld [vmem:[%s4953_s2 + $0x124] ss:$8 sps:$4 sm:$0xff]   ;;  %v3344_v22 = vld [vmem:[%s4953_s2 + $0x20] ss:$8 sps:$4 sm:$0xff]   ;;  %v3348_v23 = vld [vmem:[%s4953_s2 + $0x14] ss:$8 sps:$4 sm:$0xff]  }
   0x9   :  { %738 = vmatprep.subr.bf16.mxu1 %v3327_v10  ;;  %v3347_v24 = vld [vmem:[%s4953_s2 + $0x120] ss:$8 sps:$4 sm:$0xff]   ;;  %v3351_v25 = vld [vmem:[%s4953_s2 + $0x114] ss:$8 sps:$4 sm:$0xff]   ;;  %v3350_v26 = vld [vmem:[%s4953_s2 + $0x10] ss:$8 sps:$4 sm:$0xff]  }
   0xa   :  { %v3354_v27 = vld [vmem:[%s4953_s2 + $0x4] ss:$8 sps:$4 sm:$0xff]   ;;  %v3353_v28 = vld [vmem:[%s4953_s2 + $0x110] ss:$8 sps:$4 sm:$0xff]   ;;  %v3356_v30 = vld [vmem:[%s4953_s2] ss:$8 sps:$4 sm:$0xff]  }
   0xb   :  { %696 = vmatpush1.bf16.msra.mxu0 %v3326_v9  ;;  %v3357_v29 = vld [vmem:[%s4953_s2 + $0x104] ss:$8 sps:$4 sm:$0xff]   ;;  %v3360_v31 = vld [vmem:[%s4953_s2 + $0xf4] ss:$8 sps:$4 sm:$0xff]   ;;  %v3359_v32 = vld [vmem:[%s4953_s2 + $0x100] ss:$8 sps:$4 sm:$0xff]  }
   0xc   :  { %697 = vmatprep.subr.bf16.mxu0 %v3330_v11  ;;  %739 = vmatpush1.bf16.msra.mxu1 %v3329_v12  ;;  %v3363_v33 = vld [vmem:[%s4953_s2 + $0x1f4] ss:$8 sps:$4 sm:$0xff]   ;;  %v3362_v34 = vld [vmem:[%s4953_s2 + $0xf0] ss:$8 sps:$4 sm:$0xff]   ;;  %v3366_v35 = vld [vmem:[%s4953_s2 + $0xe4] ss:$8 sps:$4 sm:$0xff]  }
   0xd   :  { %740 = vmatprep.subr.bf16.mxu1 %v3333_v13  ;;  %v3365_v36 = vld [vmem:[%s4953_s2 + $0x1f0] ss:$8 sps:$4 sm:$0xff]   ;;  %v3369_v37 = vld [vmem:[%s4953_s2 + $0x1e4] ss:$8 sps:$4 sm:$0xff]   ;;  %v3368_v38 = vld [vmem:[%s4953_s2 + $0xe0] ss:$8 sps:$4 sm:$0xff]  }
   0xe   :  { %v3372_v39 = vld [vmem:[%s4953_s2 + $0xd4] ss:$8 sps:$4 sm:$0xff]   ;;  %v3371_v40 = vld [vmem:[%s4953_s2 + $0x1e0] ss:$8 sps:$4 sm:$0xff]   ;;  %v3374_v42 = vld [vmem:[%s4953_s2 + $0xd0] ss:$8 sps:$4 sm:$0xff]  }
   0xf   :  { %698 = vmatpush1.bf16.msra.mxu0 %v3332_v14  ;;  %v3375_v41 = vld [vmem:[%s4953_s2 + $0x1d4] ss:$8 sps:$4 sm:$0xff]   ;;  %v3378_v43 = vld [vmem:[%s4953_s2 + $0xc4] ss:$8 sps:$4 sm:$0xff]   ;;  %v3377_v44 = vld [vmem:[%s4953_s2 + $0x1d0] ss:$8 sps:$4 sm:$0xff]  }
  0x10   :  { %699 = vmatprep.subr.bf16.mxu0 %v3336_v15  ;;  %741 = vmatpush1.bf16.msra.mxu1 %v3335_v16  ;;  %v3381_v45 = vld [vmem:[%s4953_s2 + $0x1c4] ss:$8 sps:$4 sm:$0xff]   ;;  %v3380_v46 = vld [vmem:[%s4953_s2 + $0xc0] ss:$8 sps:$4 sm:$0xff]   ;;  %v3384_v48 = vld [vmem:[%s4953_s2 + $0xb4] ss:$8 sps:$4 sm:$0xff]  }
  0x11   :  { %742 = vmatprep.subr.bf16.mxu1 %v3339_v17  ;;  %v3409_v47 = vld [vmem:[%s4954_s0 + $0x4] ss:$28 sps:$4 sm:$0xff]   ;;  %v3387_v50 = vld [vmem:[%s4953_s2 + $0x1b4] ss:$8 sps:$4 sm:$0xff]   ;;  %v3416_v51 = vld [vmem:[%s4954_s0 + $0xc] ss:$28 sps:$4 sm:$0xff]  }
  0x12   :  { %v3383_v49 = vld [vmem:[%s4953_s2 + $0x1c0] ss:$8 sps:$4 sm:$0xff]   ;;  %723 = vmatprep.mubr.bf16.mxu0 %v3409_v47  ;;  %v3386_v52 = vld [vmem:[%s4953_s2 + $0xb0] ss:$8 sps:$4 sm:$0xff]   ;;  %v3390_v53 = vld [vmem:[%s4953_s2 + $0xa4] ss:$8 sps:$4 sm:$0xff]   ;;  %766 = vmatprep.mubr.bf16.mxu1 %v3416_v51 }
  0x13   :  { %700 = vmatpush1.bf16.msra.mxu0 %v3338_v18  ;;  %v3389_v54 = vld [vmem:[%s4953_s2 + $0x1b0] ss:$8 sps:$4 sm:$0xff]   ;;  %v3393_v55 = vld [vmem:[%s4953_s2 + $0x1a4] ss:$8 sps:$4 sm:$0xff]   ;;  %v3392_v56 = vld [vmem:[%s4953_s2 + $0xa0] ss:$8 sps:$4 sm:$0xff]  }
  0x14   :  { %701 = vmatprep.subr.bf16.mxu0 %v3342_v19  ;;  %743 = vmatpush1.bf16.msra.mxu1 %v3341_v20  ;;  %v3396_v57 = vld [vmem:[%s4953_s2 + $0x94] ss:$8 sps:$4 sm:$0xff]   ;;  %v3395_v58 = vld [vmem:[%s4953_s2 + $0x1a0] ss:$8 sps:$4 sm:$0xff]   ;;  %v3398_v60 = vld [vmem:[%s4953_s2 + $0x90] ss:$8 sps:$4 sm:$0xff]  }
  0x15   :  { %744 = vmatprep.subr.bf16.mxu1 %v3345_v21  ;;  %v3399_v59 = vld [vmem:[%s4953_s2 + $0x194] ss:$8 sps:$4 sm:$0xff]   ;;  %v3402_v61 = vld [vmem:[%s4953_s2 + $0x84] ss:$8 sps:$4 sm:$0xff]   ;;  %v3401_v62 = vld [vmem:[%s4953_s2 + $0x190] ss:$8 sps:$4 sm:$0xff]  }
  0x16   :  { %v3405_v63 = vld [vmem:[%s4953_s2 + $0x184] ss:$8 sps:$4 sm:$0xff]   ;;  %v3404_v0 = vld [vmem:[%s4953_s2 + $0x80] ss:$8 sps:$4 sm:$0xff]   ;;  %v3413_v1 = vld [vmem:[%s4953_s2 + $0x274] ss:$8 sps:$4 sm:$0xff]  }
  0x17   :  { %702 = vmatpush1.bf16.msra.mxu0 %v3344_v22  ;;  %v3410_v2 = vld [vmem:[%s4953_s2 + $0x180] ss:$8 sps:$4 sm:$0xff]   ;;  %v3411_v4 = vld [vmem:[%s4953_s2 + $0x270] ss:$8 sps:$4 sm:$0xff]   ;;  %v3419_v6 = vld [vmem:[%s4953_s2 + $0x264] ss:$8 sps:$4 sm:$0xff]  }
  0x18   :  { %703 = vmatprep.subr.bf16.mxu0 %v3348_v23  ;;  %745 = vmatpush1.bf16.msra.mxu1 %v3347_v24  ;;  %v3407_v3 = vld [vmem:[%s4954_s0] ss:$28 sps:$4 sm:$0xff]   ;;  %v3414_v5 = vld [vmem:[%s4954_s0 + $0x8] ss:$28 sps:$4 sm:$0xff]   ;;  %v3823_v11 = vmov 0  }
  0x19   :  { %746 = vmatprep.subr.bf16.mxu1 %v3351_v25  ;;  %v3459_v7 = vld [vmem:[%s4953_s2 + $0x300] ss:$8 sps:$4 sm:$0xff]   ;;  %v3461_v8 = vld [vmem:[%s4953_s2 + $0x304] ss:$8 sps:$4 sm:$0xff]   ;;  %v3422_v10 = vld [vmem:[%s4953_s2 + $0x254] ss:$8 sps:$4 sm:$0xff]  }
  0x1a   :  { %v3417_v9 = vld [vmem:[%s4953_s2 + $0x260] ss:$8 sps:$4 sm:$0xff]   ;;  %v3468_v12 = vld [vmem:[%s4954_s0 + $0x14] ss:$28 sps:$4 sm:$0xff]   ;;  %v3425_v14 = vld [vmem:[%s4953_s2 + $0x244] ss:$8 sps:$4 sm:$0xff]  }
  0x1b   :  { %704 = vmatpush1.bf16.msra.mxu0 %v3350_v26  ;;  %v3420_v13 = vld [vmem:[%s4953_s2 + $0x250] ss:$8 sps:$4 sm:$0xff]   ;;  %v3423_v16 = vld [vmem:[%s4953_s2 + $0x240] ss:$8 sps:$4 sm:$0xff]   ;;  %v3428_v17 = vld [vmem:[%s4953_s2 + $0x234] ss:$8 sps:$4 sm:$0xff]  }
  0x1c   :  { %705 = vmatprep.subr.bf16.mxu0 %v3354_v27  ;;  %747 = vmatpush1.bf16.msra.mxu1 %v3353_v28  ;;  %v3465_v15 = vld [vmem:[%s4954_s0 + $0x18] ss:$28 sps:$4 sm:$0xff]   ;;  %v3431_v19 = vld [vmem:[%s4953_s2 + $0x224] ss:$8 sps:$4 sm:$0xff]   ;;  %v3429_v20 = vld [vmem:[%s4953_s2 + $0x220] ss:$8 sps:$4 sm:$0xff]  }
  0x1d   :  { %748 = vmatprep.subr.bf16.mxu1 %v3357_v29  ;;  %v3426_v18 = vld [vmem:[%s4953_s2 + $0x230] ss:$8 sps:$4 sm:$0xff]   ;;  %v3434_v21 = vld [vmem:[%s4953_s2 + $0x214] ss:$8 sps:$4 sm:$0xff]   ;;  %v3437_v23 = vld [vmem:[%s4953_s2 + $0x204] ss:$8 sps:$4 sm:$0xff]  }
  0x1e   :  { %v3432_v22 = vld [vmem:[%s4953_s2 + $0x210] ss:$8 sps:$4 sm:$0xff]   ;;  %v3435_v24 = vld [vmem:[%s4953_s2 + $0x200] ss:$8 sps:$4 sm:$0xff]   ;;  %v3440_v25 = vld [vmem:[%s4953_s2 + $0x2f4] ss:$8 sps:$4 sm:$0xff]  }
  0x1f   :  { %706 = vmatpush1.bf16.msra.mxu0 %v3356_v30  ;;  %v3438_v26 = vld [vmem:[%s4953_s2 + $0x2f0] ss:$8 sps:$4 sm:$0xff]   ;;  %v3443_v27 = vld [vmem:[%s4953_s2 + $0x2e4] ss:$8 sps:$4 sm:$0xff]   ;;  %v3441_v28 = vld [vmem:[%s4953_s2 + $0x2e0] ss:$8 sps:$4 sm:$0xff]  }
  0x20   :  { %707 = vmatprep.subr.bf16.mxu0 %v3360_v31  ;;  %749 = vmatpush1.bf16.msra.mxu1 %v3359_v32  ;;  %v3446_v29 = vld [vmem:[%s4953_s2 + $0x2d4] ss:$8 sps:$4 sm:$0xff]   ;;  %v3444_v30 = vld [vmem:[%s4953_s2 + $0x2d0] ss:$8 sps:$4 sm:$0xff]   ;;  %v3449_v31 = vld [vmem:[%s4953_s2 + $0x2c4] ss:$8 sps:$4 sm:$0xff]  }
  0x21   :  { %750 = vmatprep.subr.bf16.mxu1 %v3363_v33  ;;  %v3447_v32 = vld [vmem:[%s4953_s2 + $0x2c0] ss:$8 sps:$4 sm:$0xff]   ;;  %v3452_v33 = vld [vmem:[%s4953_s2 + $0x2b4] ss:$8 sps:$4 sm:$0xff]  }
  0x22   :  { %v3477_v47 = vld [vmem:[%s4955_s4 + $0xc4] ss:$16 sps:$4 sm:$0xff]   ;;  %v3481_v51 = vld [vmem:[%s4955_s4 + $0xa0] ss:$16 sps:$4 sm:$0xff]  }
  0x23   :  { %708 = vmatpush2.bf16.msra.mxu0 %v3362_v34  ;;  %v3450_v34 = vld [vmem:[%s4953_s2 + $0x2b0] ss:$8 sps:$4 sm:$0xff]  }
  0x24   :  { %709 = vmatprep.subr.bf16.mxu0 %v3366_v35  ;;  %751 = vmatpush2.bf16.msra.mxu1 %v3365_v36  ;;  %v3455_v35 = vld [vmem:[%s4953_s2 + $0x2a4] ss:$8 sps:$4 sm:$0xff]   ;;  %v3453_v36 = vld [vmem:[%s4953_s2 + $0x2a0] ss:$8 sps:$4 sm:$0xff]  }
  0x25   :  { %752 = vmatprep.subr.bf16.mxu1 %v3369_v37  ;;  %v3458_v37 = vld [vmem:[%s4953_s2 + $0x294] ss:$8 sps:$4 sm:$0xff]  }
  0x27   :  { %710 = vmatpush2.bf16.msra.mxu0 %v3368_v38  ;;  %v3456_v38 = vld [vmem:[%s4953_s2 + $0x290] ss:$8 sps:$4 sm:$0xff]  }
  0x28   :  { %711 = vmatprep.subr.bf16.mxu0 %v3372_v39  ;;  %753 = vmatpush2.bf16.msra.mxu1 %v3371_v40  ;;  %v3464_v39 = vld [vmem:[%s4953_s2 + $0x284] ss:$8 sps:$4 sm:$0xff]   ;;  %v3462_v40 = vld [vmem:[%s4953_s2 + $0x280] ss:$8 sps:$4 sm:$0xff]  }
  0x29   :  { %754 = vmatprep.subr.bf16.mxu1 %v3375_v41  ;;  %v3466_v41 = vld [vmem:[%s4954_s0 + $0x10] ss:$28 sps:$4 sm:$0xff]  }
  0x2b   :  { %712 = vmatpush2.bf16.msra.mxu0 %v3374_v42  ;;  %v3469_v42 = vld [vmem:[%s4955_s4 + $0xe0] ss:$16 sps:$4 sm:$0xff]  }
  0x2c   :  { %713 = vmatprep.subr.bf16.mxu0 %v3378_v43  ;;  %755 = vmatpush2.bf16.msra.mxu1 %v3377_v44  ;;  %v3471_v43 = vld [vmem:[%s4955_s4 + $0xe4] ss:$16 sps:$4 sm:$0xff]   ;;  %v3472_v44 = vld [vmem:[%s4955_s4 + $0xe8] ss:$16 sps:$4 sm:$0xff]  }
  0x2d   :  { %756 = vmatprep.subr.bf16.mxu1 %v3381_v45  ;;  %v3474_v45 = vld [vmem:[%s4955_s4 + $0xec] ss:$16 sps:$4 sm:$0xff]  }
  0x2f   :  { %714 = vmatpush2.bf16.msra.mxu0 %v3380_v46  ;;  %v3475_v46 = vld [vmem:[%s4955_s4 + $0xc0] ss:$16 sps:$4 sm:$0xff]  }
  0x30   :  { %715 = vmatprep.subr.bf16.mxu0 %v3384_v48  ;;  %757 = vmatpush2.bf16.msra.mxu1 %v3383_v49  ;;  %v3478_v48 = vld [vmem:[%s4955_s4 + $0xc8] ss:$16 sps:$4 sm:$0xff]   ;;  %v3480_v49 = vld [vmem:[%s4955_s4 + $0xcc] ss:$16 sps:$4 sm:$0xff]  }
  0x31   :  { %758 = vmatprep.subr.bf16.mxu1 %v3387_v50  ;;  %v3483_v50 = vld [vmem:[%s4955_s4 + $0xa4] ss:$16 sps:$4 sm:$0xff]  }
  0x33   :  { %716 = vmatpush2.bf16.msra.mxu0 %v3386_v52  ;;  %v3486_v52 = vld [vmem:[%s4955_s4 + $0xac] ss:$16 sps:$4 sm:$0xff]  }
  0x34   :  { %717 = vmatprep.subr.bf16.mxu0 %v3390_v53  ;;  %759 = vmatpush2.bf16.msra.mxu1 %v3389_v54  ;;  %v3484_v53 = vld [vmem:[%s4955_s4 + $0xa8] ss:$16 sps:$4 sm:$0xff]   ;;  %v3489_v54 = vld [vmem:[%s4955_s4 + $0x84] ss:$16 sps:$4 sm:$0xff]  }
  0x35   :  { %760 = vmatprep.subr.bf16.mxu1 %v3393_v55  ;;  %v3492_v55 = vld [vmem:[%s4955_s4 + $0x8c] ss:$16 sps:$4 sm:$0xff]  }
  0x37   :  { %718 = vmatpush2.bf16.msra.mxu0 %v3392_v56  ;;  %v3487_v56 = vld [vmem:[%s4955_s4 + $0x80] ss:$16 sps:$4 sm:$0xff]  }
  0x38   :  { %719 = vmatprep.subr.bf16.mxu0 %v3396_v57  ;;  %761 = vmatpush2.bf16.msra.mxu1 %v3395_v58  ;;  %v3490_v57 = vld [vmem:[%s4955_s4 + $0x88] ss:$16 sps:$4 sm:$0xff]   ;;  %v3495_v58 = vld [vmem:[%s4955_s4 + $0x64] ss:$16 sps:$4 sm:$0xff]  }
  0x39   :  { %762 = vmatprep.subr.bf16.mxu1 %v3399_v59  ;;  %v3498_v59 = vld [vmem:[%s4955_s4 + $0x6c] ss:$16 sps:$4 sm:$0xff]  }
  0x3b   :  { %720 = vmatpush2.bf16.msra.mxu0 %v3398_v60  ;;  %v3493_v60 = vld [vmem:[%s4955_s4 + $0x60] ss:$16 sps:$4 sm:$0xff]  }
  0x3c   :  { %721 = vmatprep.subr.bf16.mxu0 %v3402_v61  ;;  %763 = vmatpush2.bf16.msra.mxu1 %v3401_v62  ;;  %v3496_v61 = vld [vmem:[%s4955_s4 + $0x68] ss:$16 sps:$4 sm:$0xff]   ;;  %v3501_v62 = vld [vmem:[%s4955_s4 + $0x44] ss:$16 sps:$4 sm:$0xff]  }
  0x3d   :  { %764 = vmatprep.subr.bf16.mxu1 %v3405_v63  ;;  %v3504_v63 = vld [vmem:[%s4955_s4 + $0x4c] ss:$16 sps:$4 sm:$0xff]  }
  0x3f   :  { %722 = vmatpush2.bf16.msra.mxu0 %v3404_v0  ;;  %v3499_v0 = vld [vmem:[%s4955_s4 + $0x40] ss:$16 sps:$4 sm:$0xff]  }
  0x40   :  { %777 = vmatprep.subr.bf16.mxu0 %v3413_v1  ;;  %765 = vmatpush2.bf16.msra.mxu1 %v3410_v2  ;;  %v3502_v1 = vld [vmem:[%s4955_s4 + $0x48] ss:$16 sps:$4 sm:$0xff]   ;;  %v3507_v2 = vld [vmem:[%s4955_s4 + $0x24] ss:$16 sps:$4 sm:$0xff]  }
  0x41   :  { %834 = vmatprep.subr.bf16.mxu1 %v3461_v8  ;;  %v3511_v8 = vld [vmem:[%s4955_s4] ss:$16 sps:$4 sm:$0xff]  }
  0x42   :  { %724 = vmatmul.mubr.bf16.vlgmr.msra.gmra.mxu0 %v3407_v3  ;;  %v3510_v3 = vld [vmem:[%s4955_s4 + $0x2c] ss:$16 sps:$4 sm:$0xff]  }
  0x43   :  { %778 = vmatpush1.bf16.msra.mxu0 %v3411_v4  ;;  %767 = vmatmul.mubr.bf16.vlgmr.msra.gmra.mxu1 %v3414_v5  ;;  %v3505_v4 = vld [vmem:[%s4955_s4 + $0x20] ss:$16 sps:$4 sm:$0xff]   ;;  %v3508_v5 = vld [vmem:[%s4955_s4 + $0x28] ss:$16 sps:$4 sm:$0xff]  }
  0x44   :  { %779 = vmatprep.subr.bf16.mxu0 %v3419_v6  ;;  %852 = vmatprep.mubr.bf16.mxu1 %v3823_v11  ;;  %v3513_v6 = vld [vmem:[%s4955_s4 + $0x4] ss:$16 sps:$4 sm:$0xff]  }
  0x45   :  { %835 = vmatpush1.bf16.msra.mxu1 %v3459_v7  ;;  %809 = vmatprep.mubr.bf16.mxu0 %v3468_v12  ;;  %v3516_v7 = vld [vmem:[%s4955_s4 + $0xc] ss:$16 sps:$4 sm:$0xff]   ;;  %v3517_v12 = vld [vmem:[%s4955_s4 + $0x1e0] ss:$16 sps:$4 sm:$0xff]  }
  0x46   :  { %1283 = vmatprep.subr.bf16.mxu1 %v3471_v43  ;;  %v3565_v43 = vld [vmem:[%s4956_s6 + $0x78] sm:$0xff]  }
  0x47   :  { %780 = vmatpush1.bf16.msra.mxu0 %v3417_v9  ;;  %v3514_v9 = vld [vmem:[%s4955_s4 + $0x8] ss:$16 sps:$4 sm:$0xff]  }
  0x48   :  { %781 = vmatprep.subr.bf16.mxu0 %v3422_v10  ;;  %v3519_v10 = vld [vmem:[%s4955_s4 + $0x1e4] ss:$16 sps:$4 sm:$0xff]  }
  0x4b   :  { %782 = vmatpush1.bf16.msra.mxu0 %v3420_v13  ;;  %2999 = vmatmul.mubr.msk.bf16.vlgmr.msra.gmra.mxu1 %vm687_vm0, %v3465_v15  ;;  %v3522_v13 = vld [vmem:[%s4955_s4 + $0x1ec] ss:$16 sps:$4 sm:$0xff]   ;;  %v3525_v15 = vld [vmem:[%s4955_s4 + $0x1c4] ss:$16 sps:$4 sm:$0xff]  }
  0x4c   :  { %783 = vmatprep.subr.bf16.mxu0 %v3425_v14  ;;  %1284 = vmatpush1.bf16.msra.mxu1 %v3469_v42  ;;  %v3520_v14 = vld [vmem:[%s4955_s4 + $0x1e8] ss:$16 sps:$4 sm:$0xff]   ;;  %v3564_v42 = vld [vmem:[%s4955_s4 + $0x10c] ss:$16 sps:$4 sm:$0xff]  }
  0x4d   :  { %1285 = vmatprep.subr.bf16.mxu1 %v3477_v47 }
  0x4f   :  { %784 = vmatpush1.bf16.msra.mxu0 %v3423_v16  ;;  %v3528_v16 = vld [vmem:[%s4955_s4 + $0x1cc] ss:$16 sps:$4 sm:$0xff]  }
  0x50   :  { %785 = vmatprep.subr.bf16.mxu0 %v3428_v17  ;;  %1286 = vmatpush1.bf16.msra.mxu1 %v3475_v46  ;;  %v3523_v17 = vld [vmem:[%s4955_s4 + $0x1c0] ss:$16 sps:$4 sm:$0xff]  }
  0x51   :  { %1287 = vmatprep.subr.bf16.mxu1 %v3483_v50 }
  0x53   :  { %786 = vmatpush1.bf16.msra.mxu0 %v3426_v18  ;;  %v3526_v18 = vld [vmem:[%s4955_s4 + $0x1c8] ss:$16 sps:$4 sm:$0xff]  }
  0x54   :  { %787 = vmatprep.subr.bf16.mxu0 %v3431_v19  ;;  %1288 = vmatpush1.bf16.msra.mxu1 %v3481_v51  ;;  %v3531_v19 = vld [vmem:[%s4955_s4 + $0x1a4] ss:$16 sps:$4 sm:$0xff]   ;;  %v150_v51 = vld [vmem:[%s4957_s3] sm:$0x3] }
  0x55   :  { %1289 = vmatprep.subr.bf16.mxu1 %v3489_v54 }
  0x57   :  { %788 = vmatpush1.bf16.msra.mxu0 %v3429_v20  ;;  %v3534_v20 = vld [vmem:[%s4955_s4 + $0x1ac] ss:$16 sps:$4 sm:$0xff]  }
  0x58   :  { %789 = vmatprep.subr.bf16.mxu0 %v3434_v21  ;;  %1290 = vmatpush1.bf16.msra.mxu1 %v3487_v56  ;;  %v3529_v21 = vld [vmem:[%s4955_s4 + $0x1a0] ss:$16 sps:$4 sm:$0xff]  }
  0x59   :  { %1291 = vmatprep.subr.bf16.mxu1 %v3495_v58 }
  0x5b   :  { %790 = vmatpush1.bf16.msra.mxu0 %v3432_v22  ;;  %v3532_v22 = vld [vmem:[%s4955_s4 + $0x1a8] ss:$16 sps:$4 sm:$0xff]  }
  0x5c   :  { %791 = vmatprep.subr.bf16.mxu0 %v3437_v23  ;;  %1292 = vmatpush1.bf16.msra.mxu1 %v3493_v60  ;;  %v3537_v23 = vld [vmem:[%s4955_s4 + $0x184] ss:$16 sps:$4 sm:$0xff]  }
  0x5d   :  { %1293 = vmatprep.subr.bf16.mxu1 %v3501_v62 }
  0x5f   :  { %792 = vmatpush1.bf16.msra.mxu0 %v3435_v24  ;;  %v3540_v24 = vld [vmem:[%s4955_s4 + $0x18c] ss:$16 sps:$4 sm:$0xff]  }
  0x60   :  { %793 = vmatprep.subr.bf16.mxu0 %v3440_v25  ;;  %1294 = vmatpush1.bf16.msra.mxu1 %v3499_v0  ;;  %v3535_v25 = vld [vmem:[%s4955_s4 + $0x180] ss:$16 sps:$4 sm:$0xff]  }
  0x61   :  { %1295 = vmatprep.subr.bf16.mxu1 %v3507_v2 }
  0x63   :  { %794 = vmatpush2.bf16.msra.mxu0 %v3438_v26  ;;  %v3538_v26 = vld [vmem:[%s4955_s4 + $0x188] ss:$16 sps:$4 sm:$0xff]  }
  0x64   :  { %795 = vmatprep.subr.bf16.mxu0 %v3443_v27  ;;  %1296 = vmatpush1.bf16.msra.mxu1 %v3505_v4  ;;  %v3543_v27 = vld [vmem:[%s4955_s4 + $0x164] ss:$16 sps:$4 sm:$0xff]  }
  0x65   :  { %1297 = vmatprep.subr.bf16.mxu1 %v3513_v6 }
  0x67   :  { %796 = vmatpush2.bf16.msra.mxu0 %v3441_v28  ;;  %v3546_v28 = vld [vmem:[%s4955_s4 + $0x16c] ss:$16 sps:$4 sm:$0xff]  }
  0x68   :  { %797 = vmatprep.subr.bf16.mxu0 %v3446_v29  ;;  %1298 = vmatpush1.bf16.msra.mxu1 %v3511_v8  ;;  %v3541_v29 = vld [vmem:[%s4955_s4 + $0x160] ss:$16 sps:$4 sm:$0xff]  }
  0x69   :  { %1299 = vmatprep.subr.bf16.mxu1 %v3519_v10 }
  0x6b   :  { %798 = vmatpush2.bf16.msra.mxu0 %v3444_v30  ;;  %v3544_v30 = vld [vmem:[%s4955_s4 + $0x168] ss:$16 sps:$4 sm:$0xff]  }
  0x6c   :  { %799 = vmatprep.subr.bf16.mxu0 %v3449_v31  ;;  %1300 = vmatpush2.bf16.msra.mxu1 %v3517_v12  ;;  %v3549_v31 = vld [vmem:[%s4955_s4 + $0x144] ss:$16 sps:$4 sm:$0xff]  }
  0x6d   :  { %1301 = vmatprep.subr.bf16.mxu1 %v3525_v15 }
  0x6f   :  { %800 = vmatpush2.bf16.msra.mxu0 %v3447_v32  ;;  %v3552_v32 = vld [vmem:[%s4955_s4 + $0x14c] ss:$16 sps:$4 sm:$0xff]  }
  0x70   :  { %801 = vmatprep.subr.bf16.mxu0 %v3452_v33  ;;  %1302 = vmatpush2.bf16.msra.mxu1 %v3523_v17  ;;  %v3547_v33 = vld [vmem:[%s4955_s4 + $0x140] ss:$16 sps:$4 sm:$0xff]  }
  0x71   :  { %1303 = vmatprep.subr.bf16.mxu1 %v3531_v19 }
  0x73   :  { %802 = vmatpush2.bf16.msra.mxu0 %v3450_v34  ;;  %v3550_v34 = vld [vmem:[%s4955_s4 + $0x148] ss:$16 sps:$4 sm:$0xff]  }
  0x74   :  { %803 = vmatprep.subr.bf16.mxu0 %v3455_v35  ;;  %1304 = vmatpush2.bf16.msra.mxu1 %v3529_v21  ;;  %v3555_v35 = vld [vmem:[%s4955_s4 + $0x124] ss:$16 sps:$4 sm:$0xff]  }
  0x75   :  { %1305 = vmatprep.subr.bf16.mxu1 %v3537_v23 }
  0x77   :  { %804 = vmatpush2.bf16.msra.mxu0 %v3453_v36  ;;  %v3558_v36 = vld [vmem:[%s4955_s4 + $0x12c] ss:$16 sps:$4 sm:$0xff]  }
  0x78   :  { %805 = vmatprep.subr.bf16.mxu0 %v3458_v37  ;;  %1306 = vmatpush2.bf16.msra.mxu1 %v3535_v25  ;;  %v3553_v37 = vld [vmem:[%s4955_s4 + $0x120] ss:$16 sps:$4 sm:$0xff]  }
  0x79   :  { %1307 = vmatprep.subr.bf16.mxu1 %v3543_v27 }
  0x7b   :  { %806 = vmatpush2.bf16.msra.mxu0 %v3456_v38  ;;  %v3556_v38 = vld [vmem:[%s4955_s4 + $0x128] ss:$16 sps:$4 sm:$0xff]  }
  0x7c   :  { %807 = vmatprep.subr.bf16.mxu0 %v3464_v39  ;;  %1308 = vmatpush2.bf16.msra.mxu1 %v3541_v29  ;;  %v3559_v39 = vld [vmem:[%s4955_s4 + $0x100] ss:$16 sps:$4 sm:$0xff]   ;;  %v3566_v29 = vld [vmem:[%s4956_s6 + $0x38] sm:$0xff]  }
  0x7d   :  { %1309 = vmatprep.subr.bf16.mxu1 %v3549_v31  ;;  %v3567_v31 = vld [vmem:[%s4956_s6 + $0x70] sm:$0xff]  }
  0x7f   :  { %808 = vmatpush2.bf16.msra.mxu0 %v3462_v40  ;;  %v3561_v40 = vld [vmem:[%s4955_s4 + $0x104] ss:$16 sps:$4 sm:$0xff]  }
  0x80   :  { %1326 = vmatprep.subr.bf16.mxu0 %v3474_v45  ;;  %1310 = vmatpush2.bf16.msra.mxu1 %v3547_v33  ;;  %v3569_v33 = vld [vmem:[%s4956_s6 + $0x68] sm:$0xff]  }
  0x81   :  { %1311 = vmatprep.subr.bf16.mxu1 %v3555_v35  ;;  %v3571_v35 = vld [vmem:[%s4956_s6 + $0x60] sm:$0xff]  }
  0x82   :  { %810 = vmatmul.mubr.bf16.vlgmr.msra.gmra.mxu0 %v3466_v41  ;;  %v3562_v41 = vld [vmem:[%s4955_s4 + $0x108] ss:$16 sps:$4 sm:$0xff]  }
  0x83   :  { %1327 = vmatpush1.bf16.msra.mxu0 %v3472_v44  ;;  %v152_v44 = vlaneseq }
  0x84   :  { %1328 = vmatprep.subr.bf16.mxu0 %v3480_v49  ;;  %1312 = vmatpush2.bf16.msra.mxu1 %v3553_v37  ;;  %v3573_v37 = vld [vmem:[%s4956_s6 + $0x58] sm:$0xff]  }
  0x85   :  { %1313 = vmatprep.subr.bf16.mxu1 %v3561_v40  ;;  %v4406_v46 = vshrl.u32 %v152_v44, 7  ;;  %v3576_v40 = vld [vmem:[%s4956_s6 + $0x10] sm:$0xff]   ;;  %v3580_v44 = vld [vmem:[%s4956_s6] sm:$0xff]  }
  0x87   :  { %1329 = vmatpush1.bf16.msra.mxu0 %v3478_v48  ;;  %v4409_v49 = vsub.s32 0, %v4406_v46  ;;  %v4412_v50 = vsub.s32 1, %v4406_v46 }
  0x88   :  { %1330 = vmatprep.subr.bf16.mxu0 %v3486_v52  ;;  %1314 = vmatpush2.bf16.msra.mxu1 %v3559_v39  ;;  %v3575_v39 = vld [vmem:[%s4956_s6 + $0x50] sm:$0xff]  }
  0x89   :  { %3244 = vmatprep.subr.bf16.mxu1 %v3565_v43  ;;  %v155_v54 = vrot.slane %v150_v51, %v4409_v49  ;;  %v3579_v43 = vld [vmem:[%s4956_s6 + $0x40] sm:$0xff]  }
  0x8b   :  { %1331 = vmatpush1.bf16.msra.mxu0 %v3484_v53 }
  0x8c   :  { %1332 = vmatprep.subr.bf16.mxu0 %v3492_v55  ;;  %v159_v55 = vrot.slane %v150_v51, %v4412_v50 }
  0x8f   :  { %1333 = vmatpush1.bf16.msra.mxu0 %v3490_v57 }
  0x90   :  { %1334 = vmatprep.subr.bf16.mxu0 %v3498_v59 }
  0x93   :  { %1335 = vmatpush1.bf16.msra.mxu0 %v3496_v61 }
  0x94   :  { %1336 = vmatprep.subr.bf16.mxu0 %v3504_v63 }
  0x97   :  { %1337 = vmatpush1.bf16.msra.mxu0 %v3502_v1 }
  0x98   :  { %1338 = vmatprep.subr.bf16.mxu0 %v3510_v3 }
  0x9b   :  { %1339 = vmatpush1.bf16.msra.mxu0 %v3508_v5 }
  0x9c   :  { %1340 = vmatprep.subr.bf16.mxu0 %v3516_v7 }
  0x9f   :  { %1341 = vmatpush1.bf16.msra.mxu0 %v3514_v9 }
  0xa0   :  { %1342 = vmatprep.subr.bf16.mxu0 %v3522_v13 }
  0xa3   :  { %1343 = vmatpush2.bf16.msra.mxu0 %v3520_v14 }
  0xa4   :  { %1344 = vmatprep.subr.bf16.mxu0 %v3528_v16 }
  0xa7   :  { %1345 = vmatpush2.bf16.msra.mxu0 %v3526_v18 }
  0xa8   :  { %1346 = vmatprep.subr.bf16.mxu0 %v3534_v20 }
  0xab   :  { %1347 = vmatpush2.bf16.msra.mxu0 %v3532_v22 }
  0xac   :  { %1348 = vmatprep.subr.bf16.mxu0 %v3540_v24 }
  0xaf   :  { %1349 = vmatpush2.bf16.msra.mxu0 %v3538_v26 }
  0xb0   :  { %1350 = vmatprep.subr.bf16.mxu0 %v3546_v28 }
  0xb3   :  { %1351 = vmatpush2.bf16.msra.mxu0 %v3544_v30 }
  0xb4   :  { %1352 = vmatprep.subr.bf16.mxu0 %v3552_v32  ;;  %v3568_v32 = vld [vmem:[%s4956_s6 + $0x30] sm:$0xff]  }
  0xb7   :  { %1353 = vmatpush2.bf16.msra.mxu0 %v3550_v34  ;;  %v3570_v34 = vld [vmem:[%s4956_s6 + $0x28] sm:$0xff]  }
  0xb8   :  { %1354 = vmatprep.subr.bf16.mxu0 %v3558_v36  ;;  %v3572_v36 = vld [vmem:[%s4956_s6 + $0x20] sm:$0xff]  }
  0xbb   :  { %1355 = vmatpush2.bf16.msra.mxu0 %v3556_v38  ;;  %v3574_v38 = vld [vmem:[%s4956_s6 + $0x18] sm:$0xff]  }
  0xbc   :  { %1356 = vmatprep.subr.bf16.mxu0 %v3564_v42  ;;  %v3578_v42 = vld [vmem:[%s4956_s6 + $0x8] sm:$0xff]  }
  0xbf   :  { %1357 = vmatpush2.bf16.msra.mxu0 %v3562_v41  ;;  %v3577_v41 = vld [vmem:[%s4956_s6 + $0x48] sm:$0xff]  }
 0x102   :  { %v725_v47 = vpop.f32.mrf.mxu0 }
 0x103   :  { %v768_v45 = vpop.f32.mrf.mxu1  ;;  %v726_v58 = vadd.f32 %v725_v47, %v155_v54  ;;  %v941_v47 = vld [vmem:[%s4958_s5] sm:$0xf] }
 0x104   :  { %v727_v52 = vpop.f32.mrf.mxu0 }
 0x105   :  { %v770_v48 = vpop.f32.mrf.mxu1  ;;  %v728_v59 = vadd.f32 %v727_v52, %v159_v55  ;;  %v769_v0 = vadd.f32 %v768_v45, %v726_v58  ;;  %v3581_v45 = vld [vmem:[%s4956_s6 + $0xf8] sm:$0xff]  }
 0x106   :  { %v729_v56 = vpop.f32.mrf.mxu0 }
 0x107   :  { %v772_v53 = vpop.f32.mrf.mxu1  ;;  %v730_v62 = vadd.f32 %v729_v56, %v155_v54  ;;  %v771_v1 = vadd.f32 %v770_v48, %v728_v59  ;;  %v957_v48 = vsub.s32 3, %v4406_v46  ;;  %v946_v54 = vrot.slane %v941_v47, %v4409_v49 }
 0x108   :  { %v731_v61 = vpop.f32.mrf.mxu0 }
 0x109   :  { %v774_v57 = vpop.f32.mrf.mxu1  ;;  %v732_v3 = vadd.f32 %v731_v61, %v159_v55  ;;  %v773_v5 = vadd.f32 %v772_v53, %v730_v62  ;;  %v950_v53 = vrot.slane %v941_v47, %v4412_v50 }
 0x10b   :  { %v854_v60 = vpop.f32.mrf.mxu1  ;;  %v775_v12 = vadd.f32 %v774_v57, %v732_v3  ;;  %v958_v57 = vrot.slane %v941_v47, %v957_v48 }
 0x10d   :  { %v856_v2 = vpop.f32.mrf.mxu1 }
 0x10f   :  { %v858_v9 = vpop.f32.mrf.mxu1 }
 0x111   :  { %v860_v18 = vpop.f32.mrf.mxu1 }
 0x142   :  { %v811_v63 = vpop.f32.mrf.mxu0 }
 0x143   :  { %v812_v6 = vadd.f32 %v811_v63, %v769_v0 }
 0x144   :  { %v813_v4 = vpop.f32.mrf.mxu0 }
 0x145   :  { %v814_v7 = vadd.f32 %v813_v4, %v771_v1  ;;  %v855_v15 = vadd.f32 %v854_v60, %v812_v6 }
 0x146   :  { %v815_v8 = vpop.f32.mrf.mxu0 }
 0x147   :  { %v816_v10 = vadd.f32 %v815_v8, %v773_v5  ;;  %v857_v13 = vadd.f32 %v856_v2, %v814_v7  ;;  %v867_v22 = vmul.f32 0.01, %v855_v15  ;;  %vm863_vm3 = vcmp.gt.f32.partialorder %v855_v15, 0.0 }
 0x148   :  { %v817_v14 = vpop.f32.mrf.mxu0 }
 0x149   :  { %v859_v16 = vadd.f32 %v858_v9, %v816_v10  ;;  %v818_v17 = vadd.f32 %v817_v14, %v775_v12  ;;  %v868_v20 = vmul.f32 0.01, %v857_v13  ;;  %vm864_vm2 = vcmp.gt.f32.partialorder %v857_v13, 0.0  ;;  %v3582_v12 = vld [vmem:[%s4956_s6 + $0xb8] sm:$0xff]   ;;  %v3583_v14 = vld [vmem:[%s4956_s6 + $0xf0] sm:$0xff]  }
 0x14a   :  { %v871_v27 = vsel %vm863_vm3, %v855_v15, %v867_v22  ;;  %v3590_v22 = vld [vmem:[%s4956_s6 + $0x98] sm:$0xff]  }
 0x14b   :  { %v869_v19 = vmul.f32 0.01, %v859_v16  ;;  %vm865_vm1 = vcmp.gt.f32.partialorder %v859_v16, 0.0  ;;  %v861_v21 = vadd.f32 %v860_v18, %v818_v17  ;;  %v872_v25 = vsel %vm864_vm2, %v857_v13, %v868_v20  ;;  %v3585_v17 = vld [vmem:[%s4956_s6 + $0xe8] sm:$0xff]   ;;  %v3588_v20 = vld [vmem:[%s4956_s6 + $0xa0] sm:$0xff]  }
 0x14c   :  { %v3586_v18 = vld [vmem:[%s4956_s6 + $0xa8] sm:$0xff]  }
 0x14d   :  { %vm866_vm4 = vcmp.gt.f32.partialorder %v861_v21, 0.0  ;;  %v870_v23 = vmul.f32 0.01, %v861_v21  ;;  %v873_v24 = vsel %vm865_vm1, %v859_v16, %v869_v19  ;;  %v3584_v16 = vld [vmem:[%s4956_s6 + $0xb0] sm:$0xff]   ;;  %v3587_v19 = vld [vmem:[%s4956_s6 + $0xe0] sm:$0xff]  }
 0x14e   :  { %v875_v30 = vpack.c.bf16 %v873_v24, %v871_v27  ;;  %v953_v24 = vsub.s32 2, %v4406_v46 }
 0x14f   :  { %v874_v26 = vsel %vm866_vm4, %v861_v21, %v870_v23  ;;  %v3589_v21 = vld [vmem:[%s4956_s6 + $0xd8] sm:$0xff]   ;;  %v3591_v23 = vld [vmem:[%s4956_s6 + $0xd0] sm:$0xff]  }
 0x150   :  { %v876_v28 = vpack.c.bf16 %v874_v26, %v872_v25  ;;  %v3592_v25 = vld [vmem:[%s4956_s6 + $0x90] sm:$0xff]   ;;  %v3593_v26 = vld [vmem:[%s4956_s6 + $0xc8] sm:$0xff]   ;;  %v954_v27 = vrot.slane %v941_v47, %v953_v24 }
 0x152   :  { %1315 = vmatprep.mubr.bf16.mxu1 %v876_v28  ;;  %1358 = vmatprep.mubr.bf16.mxu0 %v876_v28  ;;  %v3594_v28 = vld [vmem:[%s4956_s6 + $0x88] sm:$0xff]  }
 0x153   :  { %1316 = vmatmul.mubr.bf16.vlgmr.msra.gmra.mxu1 %v875_v30  ;;  %1359 = vmatmul.mubr.bf16.vlgmr.msra.gmra.mxu0 %v875_v30  ;;  %v3595_v30 = vld [vmem:[%s4956_s6 + $0xc0] sm:$0xff]  }
 0x154   :  { %3245 = vmatpush3.bf16.msra.mxu1 %v3566_v29 }
 0x155   :  { %3246 = vmatprep.subr.bf16.mxu1 %v3567_v31 }
 0x158   :  { %3247 = vmatpush3.bf16.msra.mxu1 %v3568_v32  ;;  %v3596_v32 = vld [vmem:[%s4956_s6 + $0x80] sm:$0xff]  }
 0x159   :  { %3248 = vmatprep.subr.bf16.mxu1 %v3569_v33 }
 0x15c   :  { %3249 = vmatpush3.bf16.msra.mxu1 %v3570_v34 }
 0x15d   :  { %3250 = vmatprep.subr.bf16.mxu1 %v3571_v35 }
 0x160   :  { %3251 = vmatpush3.bf16.msra.mxu1 %v3572_v36 }
 0x161   :  { %3252 = vmatprep.subr.bf16.mxu1 %v3573_v37 }
 0x164   :  { %3253 = vmatpush3.bf16.msra.mxu1 %v3574_v38 }
 0x165   :  { %3254 = vmatprep.subr.bf16.mxu1 %v3575_v39 }
 0x168   :  { %3255 = vmatpush3.bf16.msra.mxu1 %v3576_v40 }
 0x169   :  { %3256 = vmatprep.subr.bf16.mxu1 %v3577_v41  ;;  %v3064_v41 = vld [vmem:[%s4959_s7] ss:$0 sm:$0xff] }
 0x16c   :  { %3257 = vmatpush3.bf16.msra.mxu1 %v3578_v42 }
 0x16d   :  { %3258 = vmatprep.subr.bf16.mxu1 %v3579_v43 }
 0x170   :  { %3259 = vmatpush3.bf16.msra.mxu1 %v3580_v44 }
 0x171   :  { %3266 = vmatprep.subr.bf16.mxu1 %v3581_v45 }
 0x213   :  { %v1317_v51 = vpop.f32.mrf.mxu1  ;;  %v1360_v52 = vpop.f32.mrf.mxu0 }
 0x214   :  { %v1318_v62 = vadd.f32 %v1317_v51, %v946_v54  ;;  %v1361_v31 = vadd.f32 %v1360_v52, %v954_v27 }
 0x215   :  { %v1319_v55 = vpop.f32.mrf.mxu1  ;;  %v1362_v56 = vpop.f32.mrf.mxu0 }
 0x216   :  { %v1320_v60 = vadd.f32 %v1319_v55, %v950_v53  ;;  %v1363_v1 = vadd.f32 %v1362_v56, %v958_v57  ;;  %v1369_v8 = vmax.f32 %v1318_v62, 0.0  ;;  %v1371_v34 = vmax.f32 %v1361_v31, 0.0  ;;  %v3602_v62 = vld [vmem:[%s4961_s8 + $0x4] ss:$8 sps:$4 sm:$0xff]  }
 0x217   :  { %v1321_v58 = vpop.f32.mrf.mxu1  ;;  %v1364_v59 = vpop.f32.mrf.mxu0  ;;  %v1726_v31 = vld [vmem:[%s4963_s1] sm:$0xff] }
 0x218   :  { %v1322_v61 = vadd.f32 %v1321_v58, %v946_v54  ;;  %v1370_v5 = vmax.f32 %v1320_v60, 0.0  ;;  %v1372_v9 = vmax.f32 %v1363_v1, 0.0  ;;  %v1365_v29 = vadd.f32 %v1364_v59, %v954_v27  ;;  %v3599_v59 = vld [vmem:[%s4961_s8 + $0x14] ss:$8 sps:$4 sm:$0xff]   ;;  %v3671_v27 = vld [vmem:[%s4962_s10 + $0x2a4] ss:$28 sps:$4 sm:$0xff]  }
 0x219   :  { %v1323_v63 = vpop.f32.mrf.mxu1  ;;  %v1366_v0 = vpop.f32.mrf.mxu0 }
 0x21a   :  { %v1324_v2 = vadd.f32 %v1323_v63, %v950_v53  ;;  %v1367_v3 = vadd.f32 %v1366_v0, %v958_v57  ;;  %v1373_v4 = vmax.f32 %v1322_v61, 0.0  ;;  %v1375_v33 = vmax.f32 %v1365_v29, 0.0  ;;  %v3597_v61 = vld [vmem:[%s4961_s8 + $0x10] ss:$8 sps:$4 sm:$0xff]   ;;  %v3600_v63 = vld [vmem:[%s4961_s8] ss:$8 sps:$4 sm:$0xff]  }
 0x21b   :  { %v3603_v0 = vld [vmem:[%s4962_s10 + $0x188] ss:$28 sps:$4 sm:$0xff]  }
 0x21c   :  { %v1374_v6 = vmax.f32 %v1324_v2, 0.0  ;;  %v1376_v7 = vmax.f32 %v1367_v3, 0.0  ;;  %v1377_v13 = vpack.c.bf16 %v1373_v4, %v1369_v8  ;;  %v1379_v35 = vpack.c.bf16 %v1375_v33, %v1371_v34  ;;  %v3605_v2 = vld [vmem:[%s4962_s10 + $0x18c] ss:$28 sps:$4 sm:$0xff]   ;;  %v3608_v3 = vld [vmem:[%s4962_s10 + $0x194] ss:$28 sps:$4 sm:$0xff]  }
 0x21d   :  { %2577 = vmatprep.subr.bf16.mxu0 %v3605_v2  ;;  %v3611_v4 = vld [vmem:[%s4962_s10 + $0x154] ss:$28 sps:$4 sm:$0xff]   ;;  %v3677_v29 = vld [vmem:[%s4962_s10 + $0x26c] ss:$28 sps:$4 sm:$0xff]  }
 0x21e   :  { %v1378_v10 = vpack.c.bf16 %v1374_v6, %v1370_v5  ;;  %v1380_v15 = vpack.c.bf16 %v1376_v7, %v1372_v9  ;;  %2578 = vmatpush1.bf16.msra.mxu0 %v3603_v0  ;;  %v3609_v5 = vld [vmem:[%s4962_s10 + $0x150] ss:$28 sps:$4 sm:$0xff]   ;;  %v3617_v7 = vld [vmem:[%s4962_s10 + $0x11c] ss:$28 sps:$4 sm:$0xff]   ;;  %v3623_v9 = vld [vmem:[%s4962_s10 + $0xe4] ss:$28 sps:$4 sm:$0xff]  }
 0x21f   :  { %2579 = vmatprep.subr.bf16.mxu0 %v3611_v4  ;;  %v3615_v8 = vld [vmem:[%s4962_s10 + $0x118] ss:$28 sps:$4 sm:$0xff]   ;;  %v1727_v33 = vld [vmem:[%s4963_s1 + $0x8] sm:$0xff] }
 0x220   :  { %1676 = vmatprep.mubr.bf16.mxu1 %v1378_v10  ;;  %v3621_v10 = vld [vmem:[%s4962_s10 + $0xe0] ss:$28 sps:$4 sm:$0xff]   ;;  %v3674_v0 = vld [vmem:[%s4962_s10 + $0x2ac] ss:$28 sps:$4 sm:$0xff]   ;;  %v3680_v2 = vld [vmem:[%s4962_s10 + $0x274] ss:$28 sps:$4 sm:$0xff]  }
 0x221   :  { %1677 = vmatmul.mubr.bf16.vlgmr.msra.gmra.mxu1 %v1377_v13  ;;  %v3627_v13 = vld [vmem:[%s4962_s10 + $0xa8] ss:$28 sps:$4 sm:$0xff]   ;;  %v3683_v4 = vld [vmem:[%s4962_s10 + $0x234] ss:$28 sps:$4 sm:$0xff]  }
 0x222   :  { %3267 = vmatpush3.bf16.msra.mxu1 %v3582_v12  ;;  %1717 = vmatprep.mubr.bf16.mxu1 %v1380_v15  ;;  %v3629_v12 = vld [vmem:[%s4962_s10 + $0xac] ss:$28 sps:$4 sm:$0xff]  }
 0x223   :  { %3268 = vmatprep.subr.bf16.mxu1 %v3583_v14  ;;  %2580 = vmatpush1.bf16.msra.mxu0 %v3609_v5  ;;  %v3635_v14 = vld [vmem:[%s4962_s10 + $0x74] ss:$28 sps:$4 sm:$0xff]   ;;  %v3686_v5 = vld [vmem:[%s4962_s10 + $0x23c] ss:$28 sps:$4 sm:$0xff]  }
 0x224   :  { %2581 = vmatprep.subr.bf16.mxu0 %v3617_v7  ;;  %v3633_v15 = vld [vmem:[%s4962_s10 + $0x70] ss:$28 sps:$4 sm:$0xff]   ;;  %v3684_v7 = vld [vmem:[%s4962_s10 + $0x238] ss:$28 sps:$4 sm:$0xff]  }
 0x226   :  { %3269 = vmatpush3.bf16.msra.mxu1 %v3584_v16  ;;  %v3641_v16 = vld [vmem:[%s4962_s10 + $0x3c] ss:$28 sps:$4 sm:$0xff]  }
 0x227   :  { %3270 = vmatprep.subr.bf16.mxu1 %v3585_v17  ;;  %2582 = vmatpush1.bf16.msra.mxu0 %v3615_v8  ;;  %v3639_v17 = vld [vmem:[%s4962_s10 + $0x38] ss:$28 sps:$4 sm:$0xff]  }
 0x228   :  { %2583 = vmatprep.subr.bf16.mxu0 %v3623_v9  ;;  %v3689_v8 = vld [vmem:[%s4962_s10 + $0x1fc] ss:$28 sps:$4 sm:$0xff]   ;;  %v3692_v9 = vld [vmem:[%s4962_s10 + $0x204] ss:$28 sps:$4 sm:$0xff]  }
 0x22a   :  { %3271 = vmatpush3.bf16.msra.mxu1 %v3586_v18  ;;  %v3647_v18 = vld [vmem:[%s4962_s10 + $0x4] ss:$28 sps:$4 sm:$0xff]  }
 0x22b   :  { %3272 = vmatprep.subr.bf16.mxu1 %v3587_v19  ;;  %2584 = vmatpush1.bf16.msra.mxu0 %v3621_v10  ;;  %v3645_v19 = vld [vmem:[%s4962_s10] ss:$28 sps:$4 sm:$0xff]   ;;  %v3687_v10 = vld [vmem:[%s4962_s10 + $0x1f8] ss:$28 sps:$4 sm:$0xff]  }
 0x22c   :  { %2585 = vmatprep.subr.bf16.mxu0 %v3629_v12  ;;  %v3690_v12 = vld [vmem:[%s4962_s10 + $0x200] ss:$28 sps:$4 sm:$0xff]  }
 0x22e   :  { %3273 = vmatpush3.bf16.msra.mxu1 %v3588_v20  ;;  %v3653_v20 = vld [vmem:[%s4962_s10 + $0x34c] ss:$28 sps:$4 sm:$0xff]  }
 0x22f   :  { %3274 = vmatprep.subr.bf16.mxu1 %v3589_v21  ;;  %2586 = vmatpush1.bf16.msra.mxu0 %v3627_v13  ;;  %v3651_v21 = vld [vmem:[%s4962_s10 + $0x348] ss:$28 sps:$4 sm:$0xff]  }
 0x230   :  { %2587 = vmatprep.subr.bf16.mxu0 %v3635_v14  ;;  %v3695_v13 = vld [vmem:[%s4962_s10 + $0x1c4] ss:$28 sps:$4 sm:$0xff]   ;;  %v3698_v14 = vld [vmem:[%s4962_s10 + $0x1cc] ss:$28 sps:$4 sm:$0xff]  }
 0x232   :  { %3275 = vmatpush3.bf16.msra.mxu1 %v3590_v22  ;;  %v3659_v22 = vld [vmem:[%s4962_s10 + $0x314] ss:$28 sps:$4 sm:$0xff]  }
 0x233   :  { %3276 = vmatprep.subr.bf16.mxu1 %v3591_v23  ;;  %2588 = vmatpush1.bf16.msra.mxu0 %v3633_v15  ;;  %v3657_v23 = vld [vmem:[%s4962_s10 + $0x310] ss:$28 sps:$4 sm:$0xff]   ;;  %v3693_v15 = vld [vmem:[%s4962_s10 + $0x1c0] ss:$28 sps:$4 sm:$0xff]  }
 0x234   :  { %2589 = vmatprep.subr.bf16.mxu0 %v3641_v16  ;;  %v3696_v16 = vld [vmem:[%s4962_s10 + $0x1c8] ss:$28 sps:$4 sm:$0xff]  }
 0x236   :  { %3277 = vmatpush3.bf16.msra.mxu1 %v3592_v25  ;;  %v3665_v25 = vld [vmem:[%s4962_s10 + $0x2dc] ss:$28 sps:$4 sm:$0xff]  }
 0x237   :  { %3278 = vmatprep.subr.bf16.mxu1 %v3593_v26  ;;  %2590 = vmatpush1.bf16.msra.mxu0 %v3639_v17  ;;  %v3663_v26 = vld [vmem:[%s4962_s10 + $0x2d8] ss:$28 sps:$4 sm:$0xff]  }
 0x238   :  { %2591 = vmatprep.subr.bf16.mxu0 %v3647_v18  ;;  %v3701_v17 = vld [vmem:[%s4962_s10 + $0x19c] ss:$28 sps:$4 sm:$0xff]  }
 0x239   :  { %v3702_v18 = vld [vmem:[%s4962_s10 + $0x360] ss:$28 sps:$4 sm:$0xff]  }
 0x23a   :  { %3279 = vmatpush3.bf16.msra.mxu1 %v3594_v28  ;;  %v3669_v28 = vld [vmem:[%s4962_s10 + $0x2a0] ss:$28 sps:$4 sm:$0xff]  }
 0x23b   :  { %3280 = vmatprep.subr.bf16.mxu1 %v3595_v30  ;;  %2592 = vmatpush1.bf16.msra.mxu0 %v3645_v19  ;;  %v3675_v30 = vld [vmem:[%s4962_s10 + $0x268] ss:$28 sps:$4 sm:$0xff]   ;;  %v1751_v19 = vld [vmem:[%s4964_s9] sm:$0x3] }
 0x23c   :  { %2593 = vmatprep.subr.bf16.mxu0 %v3653_v20 }
 0x23e   :  { %3281 = vmatpush3.bf16.msra.mxu1 %v3596_v32 }
 0x23f   :  { %1799 = vmatprep.subr.bf16.mxu1 %v3599_v59  ;;  %2594 = vmatpush2.bf16.msra.mxu0 %v3651_v21  ;;  %v3654_v59 = vld [vmem:[%s4962_s10 + $0x350] ss:$28 sps:$4 sm:$0xff]   ;;  %v1760_v21 = vrot.slane %v1751_v19, %v4412_v50 }
 0x240   :  { %2595 = vmatprep.subr.bf16.mxu0 %v3659_v22  ;;  %v1756_v22 = vrot.slane %v1751_v19, %v4409_v49  ;;  %v3759_v19 = vld [vmem:[%s4962_s10 + $0x20c] ss:$28 sps:$4 sm:$0xff]  }
 0x241   :  { %1718 = vmatmul.mubr.bf16.vlgmr.msra.gmra.mxu1 %v1379_v35 }
 0x242   :  { %1819 = vmatprep.mubr.bf16.mxu1 %v3823_v11  ;;  %1800 = vmatpush1.bf16.msra.mxu1 %v3597_v61  ;;  %v3660_v61 = vld [vmem:[%s4962_s10 + $0x318] ss:$28 sps:$4 sm:$0xff]  }
 0x243   :  { %1801 = vmatprep.subr.bf16.mxu1 %v3602_v62  ;;  %2596 = vmatpush2.bf16.msra.mxu0 %v3657_v23  ;;  %v3668_v62 = vld [vmem:[%s4962_s10 + $0x2e4] ss:$28 sps:$4 sm:$0xff]  }
 0x244   :  { %2597 = vmatprep.subr.bf16.mxu0 %v3665_v25 }
 0x246   :  { %1802 = vmatpush1.bf16.msra.mxu1 %v3600_v63  ;;  %v3666_v63 = vld [vmem:[%s4962_s10 + $0x2e0] ss:$28 sps:$4 sm:$0xff]  }
 0x247   :  { %2620 = vmatprep.subr.bf16.mxu1 %v3608_v3  ;;  %2598 = vmatpush2.bf16.msra.mxu0 %v3663_v26  ;;  %v3678_v3 = vld [vmem:[%s4962_s10 + $0x270] ss:$28 sps:$4 sm:$0xff]  }
 0x248   :  { %2599 = vmatprep.subr.bf16.mxu0 %v3671_v27 }
 0x24b   :  { %2600 = vmatpush2.bf16.msra.mxu0 %v3669_v28 }
 0x24c   :  { %2601 = vmatprep.subr.bf16.mxu0 %v3677_v29 }
 0x24f   :  { %2602 = vmatpush2.bf16.msra.mxu0 %v3675_v30 }
 0x250   :  { %2603 = vmatprep.subr.bf16.mxu0 %v3683_v4  ;;  %v3734_v4 = vld [vmem:[%s4962_s10 + $0x10] ss:$28 sps:$4 sm:$0xff]  }
 0x2e1   :  { %v3260_v36 = vpop.f32.mrf.mxu1 }
 0x2e3   :  { %v3261_v37 = vpop.f32.mrf.mxu1 }
 0x2e4   :  { %v3262_v40 = vadd.f32 %v3261_v37, %v3260_v36 }
 0x2e5   :  { %v3263_v38 = vpop.f32.mrf.mxu1 }
 0x2e6   :  { %v1679_v44 = vadd.f32 %v3262_v40, %v3064_v41 }
 0x2e7   :  { %v3264_v39 = vpop.f32.mrf.mxu1 }
 0x2e8   :  { %v3265_v45 = vadd.f32 %v3264_v39, %v3263_v38  ;;  %v3606_v39 = vld [vmem:[%s4962_s10 + $0x190] ss:$28 sps:$4 sm:$0xff]  }
 0x2ea   :  { %v1682_v54 = vadd.f32 %v3265_v45, %v3064_v41  ;;  %v3614_v41 = vld [vmem:[%s4962_s10 + $0x15c] ss:$28 sps:$4 sm:$0xff]   ;;  %v3626_v45 = vld [vmem:[%s4962_s10 + $0xec] ss:$28 sps:$4 sm:$0xff]  }
 0x301   :  { %v3282_v42 = vpop.f32.mrf.mxu1 }
 0x303   :  { %v3283_v43 = vpop.f32.mrf.mxu1 }
 0x304   :  { %v3284_v47 = vadd.f32 %v3283_v43, %v3282_v42  ;;  %v3612_v42 = vld [vmem:[%s4962_s10 + $0x158] ss:$28 sps:$4 sm:$0xff]   ;;  %v3620_v43 = vld [vmem:[%s4962_s10 + $0x124] ss:$28 sps:$4 sm:$0xff]  }
 0x305   :  { %v3285_v51 = vpop.f32.mrf.mxu1 }
 0x306   :  { %v4527_v52 = vadd.f32 %v3284_v47, %v1679_v44  ;;  %v3618_v44 = vld [vmem:[%s4962_s10 + $0x120] ss:$28 sps:$4 sm:$0xff]   ;;  %v3624_v47 = vld [vmem:[%s4962_s10 + $0xe8] ss:$28 sps:$4 sm:$0xff]  }
 0x307   :  { %v3286_v53 = vpop.f32.mrf.mxu1 }
 0x308   :  { %v1728_v11 = vmul.f32 0.5, %v4527_v52  ;;  %2884 = vst [vmem:[%s4960_s13] sm:$0xff] %v4527_v52  ;;  %v3287_v55 = vadd.f32 %v3286_v53, %v3285_v51  ;;  %v3632_v51 = vld [vmem:[%s4962_s10 + $0xb4] ss:$28 sps:$4 sm:$0xff]   ;;  %v3638_v53 = vld [vmem:[%s4962_s10 + $0x7c] ss:$28 sps:$4 sm:$0xff]  }
 0x30a   :  { %v1730_v56 = vmul.f32 1.442695, %v1728_v11  ;;  %v4534_v57 = vadd.f32 %v3287_v55, %v1682_v54  ;;  %v3636_v54 = vld [vmem:[%s4962_s10 + $0x78] ss:$28 sps:$4 sm:$0xff]   ;;  %v3644_v11 = vld [vmem:[%s4962_s10 + $0x44] ss:$28 sps:$4 sm:$0xff]  }
 0x30b   :  { %v3642_v55 = vld [vmem:[%s4962_s10 + $0x40] ss:$28 sps:$4 sm:$0xff]  }
 0x30c   :  { %3763 = vpow2.f32 %v1730_v56  ;;  %v1729_v58 = vmul.f32 0.5, %v4534_v57  ;;  %2885 = vst [vmem:[%s4960_s13 + $0x8] sm:$0xff] %v4534_v57  ;;  %v3650_v56 = vld [vmem:[%s4962_s10 + $0xc] ss:$28 sps:$4 sm:$0xff]  }
 0x30e   :  { %v1732_v60 = vmul.f32 1.442695, %v1729_v58  ;;  %v3656_v58 = vld [vmem:[%s4962_s10 + $0x354] ss:$28 sps:$4 sm:$0xff]  }
 0x310   :  { %3765 = vpow2.f32 %v1732_v60  ;;  %v3662_v60 = vld [vmem:[%s4962_s10 + $0x31c] ss:$28 sps:$4 sm:$0xff]  }
 0x319   :  { %v3764_v1 = vpop.eup %3763 }
 0x31a   :  { %1736 = vrot.lane.b32.xlu0 %v3764_v1, %s3824_s22  ;;  %v3672_v1 = vld [vmem:[%s4962_s10 + $0x2a8] ss:$28 sps:$4 sm:$0xff]  }
 0x31d   :  { %v3766_v6 = vpop.eup %3765 }
 0x31e   :  { %1738 = vrot.lane.b32.xlu0 %v3766_v6, %s3824_s22  ;;  %v3681_v6 = vld [vmem:[%s4962_s10 + $0x230] ss:$28 sps:$4 sm:$0xff]  }
 0x31f   :  { %2604 = vmatpush2.bf16.msra.mxu0 %v3681_v6  ;;  %v3741_v6 = vld [vmem:[%s4962_s10 + $0x35c] ss:$28 sps:$4 sm:$0xff]  }
 0x320   :  { %2605 = vmatprep.subr.bf16.mxu0 %v3689_v8  ;;  %v3744_v8 = vld [vmem:[%s4962_s10 + $0x324] ss:$28 sps:$4 sm:$0xff]  }
 0x323   :  { %2606 = vmatpush2.bf16.msra.mxu0 %v3687_v10  ;;  %v3747_v10 = vld [vmem:[%s4962_s10 + $0x2ec] ss:$28 sps:$4 sm:$0xff]  }
 0x324   :  { %2607 = vmatprep.subr.bf16.mxu0 %v3695_v13  ;;  %v3750_v13 = vld [vmem:[%s4962_s10 + $0x2b4] ss:$28 sps:$4 sm:$0xff]  }
 0x327   :  { %2608 = vmatpush2.bf16.msra.mxu0 %v3693_v15  ;;  %v3753_v15 = vld [vmem:[%s4962_s10 + $0x27c] ss:$28 sps:$4 sm:$0xff]  }
 0x328   :  { %2663 = vmatprep.subr.bf16.mxu0 %v3701_v17  ;;  %v3756_v17 = vld [vmem:[%s4962_s10 + $0x244] ss:$28 sps:$4 sm:$0xff]  }
 0x38c   :  { %v1737_v32 = vpop.permute.xlu0 %1736 }
 0x38d   :  { %v1742_v34 = vmul.f32 %v1737_v32, %v1726_v31 }
 0x38f   :  { %v1744_v37 = vadd.f32 %v1742_v34, %v4527_v52  ;;  %v3630_v52 = vld [vmem:[%s4962_s10 + $0xb0] ss:$28 sps:$4 sm:$0xff]  }
 0x390   :  { %v1739_v35 = vpop.permute.xlu0 %1738 }
 0x391   :  { %v1743_v36 = vmul.f32 %v1739_v35, %v1727_v33 }
 0x393   :  { %v1745_v38 = vadd.f32 %v1743_v36, %v4534_v57  ;;  %v3648_v57 = vld [vmem:[%s4962_s10 + $0x8] ss:$28 sps:$4 sm:$0xff]   ;;  %v3699_v36 = vld [vmem:[%s4962_s10 + $0x198] ss:$28 sps:$4 sm:$0xff]  }
 0x395   :  { %v1746_v40 = vpack.c.bf16 %v1745_v38, %v1744_v37  ;;  %v3703_v37 = vld [vmem:[%s4962_s10 + $0x1a0] ss:$28 sps:$4 sm:$0xff]  }
 0x397   :  { %3101 = vmatmul.mubr.msk.bf16.vlgmr.msra.gmra.mxu1 %vm1783_vm5, %v1746_v40  ;;  %v3707_v40 = vld [vmem:[%s4962_s10 + $0x328] ss:$28 sps:$4 sm:$0xff]  }
 0x398   :  { %2621 = vmatpush1.bf16.msra.mxu1 %v3606_v39  ;;  %v3706_v39 = vld [vmem:[%s4962_s10 + $0x164] ss:$28 sps:$4 sm:$0xff]  }
 0x399   :  { %2622 = vmatprep.subr.bf16.mxu1 %v3614_v41  ;;  %v3704_v41 = vld [vmem:[%s4962_s10 + $0x160] ss:$28 sps:$4 sm:$0xff]  }
 0x39c   :  { %2623 = vmatpush1.bf16.msra.mxu1 %v3612_v42  ;;  %v3708_v42 = vld [vmem:[%s4962_s10 + $0x168] ss:$28 sps:$4 sm:$0xff]  }
 0x39d   :  { %2624 = vmatprep.subr.bf16.mxu1 %v3620_v43  ;;  %v3711_v43 = vld [vmem:[%s4962_s10 + $0x12c] ss:$28 sps:$4 sm:$0xff]  }
 0x3a0   :  { %2625 = vmatpush1.bf16.msra.mxu1 %v3618_v44  ;;  %v3712_v44 = vld [vmem:[%s4962_s10 + $0x2f0] ss:$28 sps:$4 sm:$0xff]  }
 0x3a1   :  { %2626 = vmatprep.subr.bf16.mxu1 %v3626_v45  ;;  %v3709_v45 = vld [vmem:[%s4962_s10 + $0x128] ss:$28 sps:$4 sm:$0xff]  }
 0x3a4   :  { %2627 = vmatpush1.bf16.msra.mxu1 %v3624_v47  ;;  %v3713_v47 = vld [vmem:[%s4962_s10 + $0x130] ss:$28 sps:$4 sm:$0xff]  }
 0x3a5   :  { %2628 = vmatprep.subr.bf16.mxu1 %v3632_v51  ;;  %v3716_v51 = vld [vmem:[%s4962_s10 + $0xf4] ss:$28 sps:$4 sm:$0xff]  }
 0x3a8   :  { %2629 = vmatpush1.bf16.msra.mxu1 %v3630_v52  ;;  %v3717_v52 = vld [vmem:[%s4962_s10 + $0x2b8] ss:$28 sps:$4 sm:$0xff]  }
 0x3a9   :  { %2630 = vmatprep.subr.bf16.mxu1 %v3638_v53  ;;  %v3714_v53 = vld [vmem:[%s4962_s10 + $0xf0] ss:$28 sps:$4 sm:$0xff]  }
 0x3ac   :  { %2631 = vmatpush1.bf16.msra.mxu1 %v3636_v54  ;;  %v3718_v54 = vld [vmem:[%s4962_s10 + $0xf8] ss:$28 sps:$4 sm:$0xff]  }
 0x3ad   :  { %2632 = vmatprep.subr.bf16.mxu1 %v3644_v11  ;;  %v3721_v11 = vld [vmem:[%s4962_s10 + $0xbc] ss:$28 sps:$4 sm:$0xff]  }
 0x3b0   :  { %2633 = vmatpush1.bf16.msra.mxu1 %v3642_v55  ;;  %v3722_v55 = vld [vmem:[%s4962_s10 + $0x280] ss:$28 sps:$4 sm:$0xff]  }
 0x3b1   :  { %2634 = vmatprep.subr.bf16.mxu1 %v3650_v56  ;;  %v3719_v56 = vld [vmem:[%s4962_s10 + $0xb8] ss:$28 sps:$4 sm:$0xff]  }
 0x3b4   :  { %2635 = vmatpush1.bf16.msra.mxu1 %v3648_v57  ;;  %v3723_v57 = vld [vmem:[%s4962_s10 + $0xc0] ss:$28 sps:$4 sm:$0xff]  }
 0x3b5   :  { %2636 = vmatprep.subr.bf16.mxu1 %v3656_v58  ;;  %v3726_v58 = vld [vmem:[%s4962_s10 + $0x84] ss:$28 sps:$4 sm:$0xff]  }
 0x3b8   :  { %2637 = vmatpush2.bf16.msra.mxu1 %v3654_v59  ;;  %v3727_v59 = vld [vmem:[%s4962_s10 + $0x248] ss:$28 sps:$4 sm:$0xff]  }
 0x3b9   :  { %2638 = vmatprep.subr.bf16.mxu1 %v3662_v60  ;;  %v3724_v60 = vld [vmem:[%s4962_s10 + $0x80] ss:$28 sps:$4 sm:$0xff]  }
 0x3bc   :  { %2639 = vmatpush2.bf16.msra.mxu1 %v3660_v61  ;;  %v3728_v61 = vld [vmem:[%s4962_s10 + $0x88] ss:$28 sps:$4 sm:$0xff]  }
 0x3bd   :  { %2640 = vmatprep.subr.bf16.mxu1 %v3668_v62  ;;  %v3731_v62 = vld [vmem:[%s4962_s10 + $0x4c] ss:$28 sps:$4 sm:$0xff]  }
 0x3c0   :  { %2641 = vmatpush2.bf16.msra.mxu1 %v3666_v63  ;;  %v3732_v63 = vld [vmem:[%s4962_s10 + $0x210] ss:$28 sps:$4 sm:$0xff]  }
 0x3c1   :  { %2642 = vmatprep.subr.bf16.mxu1 %v3674_v0  ;;  %v3729_v0 = vld [vmem:[%s4962_s10 + $0x48] ss:$28 sps:$4 sm:$0xff]  }
 0x3c4   :  { %2643 = vmatpush2.bf16.msra.mxu1 %v3672_v1  ;;  %v3733_v1 = vld [vmem:[%s4962_s10 + $0x50] ss:$28 sps:$4 sm:$0xff]  }
 0x3c5   :  { %2644 = vmatprep.subr.bf16.mxu1 %v3680_v2  ;;  %v3736_v2 = vld [vmem:[%s4962_s10 + $0x14] ss:$28 sps:$4 sm:$0xff]  }
 0x3c8   :  { %2645 = vmatpush2.bf16.msra.mxu1 %v3678_v3  ;;  %v3737_v3 = vld [vmem:[%s4962_s10 + $0x1d8] ss:$28 sps:$4 sm:$0xff]  }
 0x3c9   :  { %2646 = vmatprep.subr.bf16.mxu1 %v3686_v5  ;;  %v3738_v5 = vld [vmem:[%s4962_s10 + $0x18] ss:$28 sps:$4 sm:$0xff]  }
 0x3cc   :  { %2647 = vmatpush2.bf16.msra.mxu1 %v3684_v7  ;;  %v3739_v7 = vld [vmem:[%s4962_s10 + $0x358] ss:$28 sps:$4 sm:$0xff]  }
 0x3cd   :  { %2648 = vmatprep.subr.bf16.mxu1 %v3692_v9  ;;  %v3742_v9 = vld [vmem:[%s4962_s10 + $0x320] ss:$28 sps:$4 sm:$0xff]  }
 0x3d0   :  { %2649 = vmatpush2.bf16.msra.mxu1 %v3690_v12  ;;  %v3745_v12 = vld [vmem:[%s4962_s10 + $0x2e8] ss:$28 sps:$4 sm:$0xff]  }
 0x3d1   :  { %2650 = vmatprep.subr.bf16.mxu1 %v3698_v14  ;;  %v3748_v14 = vld [vmem:[%s4962_s10 + $0x2b0] ss:$28 sps:$4 sm:$0xff]  }
 0x3d4   :  { %2651 = vmatpush2.bf16.msra.mxu1 %v3696_v16  ;;  %v3751_v16 = vld [vmem:[%s4962_s10 + $0x278] ss:$28 sps:$4 sm:$0xff]  }
 0x3d5   :  { %3288 = vmatprep.subr.bf16.mxu1 %v3702_v18  ;;  %v3754_v18 = vld [vmem:[%s4962_s10 + $0x240] ss:$28 sps:$4 sm:$0xff]  }
 0x457   :  { %v1821_v20 = vpop.f32.mrf.mxu1 }
 0x458   :  { %v1822_v28 = vadd.f32 %v1821_v20, %v1756_v22  ;;  %v3757_v20 = vld [vmem:[%s4962_s10 + $0x208] ss:$28 sps:$4 sm:$0xff]  }
 0x459   :  { %v1823_v23 = vpop.f32.mrf.mxu1 }
 0x45a   :  { %v1824_v26 = vadd.f32 %v1823_v23, %v1760_v21  ;;  %v1830_v34 = vmax.f32 %v1822_v28, 0.0  ;;  %v4911_v23 = vld [vmem:[%s4965_s11] sm:$0x7f] }
 0x45b   :  { %v1825_v25 = vpop.f32.mrf.mxu1  ;;  %v1981_v28 = vrot.slane %v4911_v23, %v957_v48 }
 0x45c   :  { %v1826_v27 = vadd.f32 %v1825_v25, %v1756_v22  ;;  %v1831_v32 = vmax.f32 %v1824_v26, 0.0  ;;  %v3760_v22 = vld [vmem:[%s4962_s10 + $0x1d0] ss:$28 sps:$4 sm:$0xff]   ;;  %v1969_v25 = vrot.slane %v4911_v23, %v4409_v49  ;;  %v1977_v26 = vrot.slane %v4911_v23, %v953_v24 }
 0x45d   :  { %v1827_v29 = vpop.f32.mrf.mxu1 }
 0x45e   :  { %v1828_v30 = vadd.f32 %v1827_v29, %v1760_v21  ;;  %v1832_v31 = vmax.f32 %v1826_v27, 0.0  ;;  %v3762_v21 = vld [vmem:[%s4962_s10 + $0x1d4] ss:$28 sps:$4 sm:$0xff]   ;;  %v1973_v27 = vrot.slane %v4911_v23, %v4412_v50 }
 0x460   :  { %v1833_v33 = vmax.f32 %v1828_v30, 0.0  ;;  %v4770_v38 = vpack.c.bf16 %v1832_v31, %v1830_v34 }
 0x462   :  { %v1835_v35 = vpack.c.bf16 %v1833_v33, %v1831_v32 }
 0x464   :  { %2609 = vmatprep.mubr.bf16.mxu0 %v1835_v35  ;;  %2652 = vmatprep.mubr.bf16.mxu1 %v1835_v35 }
 0x465   :  { %2610 = vmatmul.mubr.bf16.vlgmr.msra.gmra.mxu0 %v4770_v38  ;;  %2653 = vmatmul.mubr.bf16.vlgmr.msra.gmra.mxu1 %v4770_v38 }
 0x466   :  { %2664 = vmatpush1.bf16.msra.mxu0 %v3699_v36  ;;  %3289 = vmatpush3.bf16.msra.mxu1 %v3703_v37 }
 0x467   :  { %2695 = vmatprep.mubr.bf16.mxu0 %v1835_v35  ;;  %2738 = vmatprep.mubr.bf16.mxu1 %v1835_v35 }
 0x468   :  { %2665 = vmatprep.subr.bf16.mxu0 %v3706_v39  ;;  %3290 = vmatprep.subr.bf16.mxu1 %v3707_v40 }
 0x46a   :  { %2666 = vmatpush1.bf16.msra.mxu0 %v3704_v41  ;;  %3291 = vmatpush3.bf16.msra.mxu1 %v3708_v42 }
 0x46b   :  { %2667 = vmatprep.subr.bf16.mxu0 %v3711_v43  ;;  %3292 = vmatprep.subr.bf16.mxu1 %v3712_v44 }
 0x46e   :  { %2668 = vmatpush1.bf16.msra.mxu0 %v3709_v45  ;;  %3293 = vmatpush3.bf16.msra.mxu1 %v3713_v47 }
 0x46f   :  { %2669 = vmatprep.subr.bf16.mxu0 %v3716_v51  ;;  %3294 = vmatprep.subr.bf16.mxu1 %v3717_v52 }
 0x472   :  { %2670 = vmatpush1.bf16.msra.mxu0 %v3714_v53  ;;  %3295 = vmatpush3.bf16.msra.mxu1 %v3718_v54 }
 0x473   :  { %2671 = vmatprep.subr.bf16.mxu0 %v3721_v11  ;;  %3296 = vmatprep.subr.bf16.mxu1 %v3722_v55 }
 0x476   :  { %2672 = vmatpush1.bf16.msra.mxu0 %v3719_v56  ;;  %3297 = vmatpush3.bf16.msra.mxu1 %v3723_v57 }
 0x477   :  { %2673 = vmatprep.subr.bf16.mxu0 %v3726_v58  ;;  %3298 = vmatprep.subr.bf16.mxu1 %v3727_v59 }
 0x47a   :  { %2674 = vmatpush1.bf16.msra.mxu0 %v3724_v60  ;;  %3299 = vmatpush3.bf16.msra.mxu1 %v3728_v61 }
 0x47b   :  { %2675 = vmatprep.subr.bf16.mxu0 %v3731_v62  ;;  %3300 = vmatprep.subr.bf16.mxu1 %v3732_v63 }
 0x47e   :  { %2676 = vmatpush1.bf16.msra.mxu0 %v3729_v0  ;;  %3301 = vmatpush3.bf16.msra.mxu1 %v3733_v1 }
 0x47f   :  { %2677 = vmatprep.subr.bf16.mxu0 %v3736_v2  ;;  %3302 = vmatprep.subr.bf16.mxu1 %v3737_v3 }
 0x482   :  { %2678 = vmatpush1.bf16.msra.mxu0 %v3734_v4  ;;  %3303 = vmatpush3.bf16.msra.mxu1 %v3738_v5  ;;  %v1992_v4 = vsub.s32 6, %v4406_v46 }
 0x483   :  { %2679 = vmatprep.subr.bf16.mxu0 %v3741_v6 }
 0x484   :  { %v1993_v6 = vrot.slane %v4911_v23, %v1992_v4 }
 0x485   :  { %2739 = vmatmul.mubr.bf16.vlgmr.msra.gmra.mxu1 %v4770_v38 }
 0x486   :  { %2680 = vmatpush2.bf16.msra.mxu0 %v3739_v7 }
 0x487   :  { %2681 = vmatprep.subr.bf16.mxu0 %v3744_v8 }
 0x48a   :  { %2682 = vmatpush2.bf16.msra.mxu0 %v3742_v9 }
 0x48b   :  { %2683 = vmatprep.subr.bf16.mxu0 %v3747_v10 }
 0x48e   :  { %2684 = vmatpush2.bf16.msra.mxu0 %v3745_v12 }
 0x48f   :  { %2685 = vmatprep.subr.bf16.mxu0 %v3750_v13 }
 0x492   :  { %2686 = vmatpush2.bf16.msra.mxu0 %v3748_v14 }
 0x493   :  { %2687 = vmatprep.subr.bf16.mxu0 %v3753_v15 }
 0x496   :  { %2688 = vmatpush2.bf16.msra.mxu0 %v3751_v16 }
 0x497   :  { %2689 = vmatprep.subr.bf16.mxu0 %v3756_v17 }
 0x49a   :  { %2690 = vmatpush2.bf16.msra.mxu0 %v3754_v18 }
 0x49b   :  { %2691 = vmatprep.subr.bf16.mxu0 %v3759_v19 }
 0x49e   :  { %2692 = vmatpush2.bf16.msra.mxu0 %v3757_v20 }
 0x49f   :  { %2693 = vmatprep.subr.bf16.mxu0 %v3762_v21 }
 0x4a2   :  { %2694 = vmatpush2.bf16.msra.mxu0 %v3760_v22 }
 0x4a5   :  { %2696 = vmatmul.mubr.bf16.vlgmr.msra.gmra.mxu0 %v4770_v38 }
 0x525   :  { %v2611_v29 = vpop.f32.mrf.mxu0  ;;  %v2654_v30 = vpop.f32.mrf.mxu1 }
 0x526   :  { %v2612_v31 = vadd.f32 %v2611_v29, %v1969_v25  ;;  %v2655_v32 = vadd.f32 %v2654_v30, %v1977_v26 }
 0x527   :  { %v2613_v33 = vpop.f32.mrf.mxu0  ;;  %v2656_v34 = vpop.f32.mrf.mxu1 }
 0x528   :  { %v3214_v35 = vmul.f32 -1.442695, %v2612_v31  ;;  %v3216_v36 = vmul.f32 -1.442695, %v2655_v32  ;;  %v2614_v49 = vadd.f32 %v2613_v33, %v1973_v27  ;;  %v2657_v37 = vadd.f32 %v2656_v34, %v1981_v28 }
 0x529   :  { %v2615_v38 = vpop.f32.mrf.mxu0  ;;  %v2658_v39 = vpop.f32.mrf.mxu1  ;;  %v1984_v33 = vsub.s32 4, %v4406_v46 }
 0x52a   :  { %3767 = vpow2.f32 %v3214_v35  ;;  %v3215_v24 = vmul.f32 -1.442695, %v2614_v49  ;;  %v3217_v40 = vmul.f32 -1.442695, %v2657_v37  ;;  %v2616_v50 = vadd.f32 %v2615_v38, %v1969_v25 }
 0x52b   :  { %3769 = vpow2.f32 %v3216_v36  ;;  %v2659_v41 = vadd.f32 %v2658_v39, %v1977_v26  ;;  %v2617_v42 = vpop.f32.mrf.mxu0  ;;  %v2660_v48 = vpop.f32.mrf.mxu1  ;;  %v1988_v36 = vsub.s32 5, %v4406_v46  ;;  %v1985_v49 = vrot.slane %v4911_v23, %v1984_v33 }
 0x52c   :  { %3771 = vpow2.f32 %v3215_v24  ;;  %v3221_v43 = vmul.f32 -1.442695, %v2616_v50  ;;  %v2618_v44 = vadd.f32 %v2617_v42, %v1973_v27  ;;  %v2661_v45 = vadd.f32 %v2660_v48, %v1981_v28 }
 0x52d   :  { %3773 = vpow2.f32 %v3217_v40  ;;  %v3223_v47 = vmul.f32 -1.442695, %v2659_v41  ;;  %v1989_v37 = vrot.slane %v4911_v23, %v1988_v36 }
 0x52e   :  { %3775 = vpow2.f32 %v3221_v43  ;;  %v3222_v51 = vmul.f32 -1.442695, %v2618_v44  ;;  %v3224_v52 = vmul.f32 -1.442695, %v2661_v45 }
 0x52f   :  { %3777 = vpow2.f32 %v3223_v47 }
 0x530   :  { %3779 = vpow2.f32 %v3222_v51 }
 0x531   :  { %3781 = vpow2.f32 %v3224_v52 }
 0x537   :  { %v3768_v53 = vpop.eup %3767 }
 0x538   :  { %v3770_v54 = vpop.eup %3769  ;;  %v2789_v11 = vadd.f32 1.0, %v3768_v53 }
 0x539   :  { %v3772_v55 = vpop.eup %3771  ;;  %v2791_v56 = vadd.f32 1.0, %v3770_v54 }
 0x53a   :  { %v3774_v57 = vpop.eup %3773  ;;  %3783 = vrcp.f32 %v2789_v11  ;;  %v2790_v58 = vadd.f32 1.0, %v3772_v55 }
 0x53b   :  { %v3776_v59 = vpop.eup %3775  ;;  %3785 = vrcp.f32 %v2791_v56  ;;  %v2792_v60 = vadd.f32 1.0, %v3774_v57 }
 0x53c   :  { %v3778_v61 = vpop.eup %3777  ;;  %3787 = vrcp.f32 %v2790_v58  ;;  %v2796_v62 = vadd.f32 1.0, %v3776_v59 }
 0x53d   :  { %v3780_v63 = vpop.eup %3779  ;;  %3789 = vrcp.f32 %v2792_v60  ;;  %v2798_v0 = vadd.f32 1.0, %v3778_v61 }
 0x53e   :  { %v3782_v1 = vpop.eup %3781  ;;  %3791 = vrcp.f32 %v2796_v62  ;;  %v2797_v2 = vadd.f32 1.0, %v3780_v63 }
 0x53f   :  { %3793 = vrcp.f32 %v2798_v0  ;;  %v2799_v3 = vadd.f32 1.0, %v3782_v1 }
 0x540   :  { %3795 = vrcp.f32 %v2797_v2 }
 0x541   :  { %3797 = vrcp.f32 %v2799_v3 }
 0x545   :  { %v3304_v5 = vpop.f32.mrf.mxu1 }
 0x547   :  { %v3784_v7 = vpop.eup %3783  ;;  %v3305_v8 = vpop.f32.mrf.mxu1 }
 0x548   :  { %v3786_v9 = vpop.eup %3785  ;;  %v3306_v10 = vadd.f32 %v3305_v8, %v3304_v5 }
 0x549   :  { %v3788_v12 = vpop.eup %3787  ;;  %v3307_v13 = vpop.f32.mrf.mxu1 }
 0x54a   :  { %v3790_v14 = vpop.eup %3789  ;;  %v3236_v15 = vpack.c.bf16 %v3788_v12, %v3784_v7  ;;  %v2741_v16 = vadd.f32 %v3306_v10, %v1993_v6 }
 0x54b   :  { %v3792_v17 = vpop.eup %3791  ;;  %v3237_v18 = vpack.c.bf16 %v3790_v14, %v3786_v9  ;;  %v3308_v19 = vpop.f32.mrf.mxu1 }
 0x54c   :  { %v3794_v20 = vpop.eup %3793  ;;  %2875 = vst [vmem:[%s4966_s12] sm:$0xff] %v3236_v15  ;;  %v3220_v21 = vmul.f32 -1.442695, %v2741_v16  ;;  %v3309_v22 = vadd.f32 %v3308_v19, %v3307_v13 }
 0x54d   :  { %v3796_v25 = vpop.eup %3795  ;;  %2876 = vst [vmem:[%s4966_s12 + $0x8] sm:$0xff] %v3237_v18 }
 0x54e   :  { %v3798_v26 = vpop.eup %3797  ;;  %v3240_v27 = vpack.c.bf16 %v3796_v25, %v3792_v17  ;;  %3799 = vpow2.f32 %v3220_v21  ;;  %v2744_v28 = vadd.f32 %v3309_v22, %v1993_v6 }
 0x54f   :  { %v3241_v29 = vpack.c.bf16 %v3798_v26, %v3794_v20 }
 0x550   :  { %2880 = vst [vmem:[%s4966_s12 + $0x1c] sm:$0xff] %v3240_v27  ;;  %v3227_v30 = vmul.f32 -1.442695, %v2744_v28 }
 0x551   :  { %2881 = vst [vmem:[%s4966_s12 + $0x24] sm:$0xff] %v3241_v29 }
 0x552   :  { %3801 = vpow2.f32 %v3227_v30 }
 0x55b   :  { %v3800_v31 = vpop.eup %3799 }
 0x55c   :  { %v2795_v32 = vadd.f32 1.0, %v3800_v31 }
 0x55e   :  { %3803 = vrcp.f32 %v2795_v32 }
 0x55f   :  { %v3802_v34 = vpop.eup %3801 }
 0x560   :  { %v2802_v35 = vadd.f32 1.0, %v3802_v34 }
 0x562   :  { %3805 = vrcp.f32 %v2802_v35 }
 0x565   :  { %v2697_v38 = vpop.f32.mrf.mxu0 }
 0x566   :  { %v2698_v39 = vadd.f32 %v2697_v38, %v1985_v49 }
 0x567   :  { %v2699_v24 = vpop.f32.mrf.mxu0 }
 0x568   :  { %v3218_v40 = vmul.f32 -1.442695, %v2698_v39  ;;  %v2700_v50 = vadd.f32 %v2699_v24, %v1989_v37 }
 0x569   :  { %v2701_v41 = vpop.f32.mrf.mxu0 }
 0x56a   :  { %3807 = vpow2.f32 %v3218_v40  ;;  %v3219_v42 = vmul.f32 -1.442695, %v2700_v50  ;;  %v2702_v48 = vadd.f32 %v2701_v41, %v1985_v49 }
 0x56b   :  { %v3804_v43 = vpop.eup %3803  ;;  %v2703_v44 = vpop.f32.mrf.mxu0 }
 0x56c   :  { %v3239_v45 = vpack.c.bf16 %v3804_v43, %v3804_v43  ;;  %3809 = vpow2.f32 %v3219_v42  ;;  %v3225_v46 = vmul.f32 -1.442695, %v2702_v48  ;;  %v2704_v47 = vadd.f32 %v2703_v44, %v1989_v37 }
 0x56e   :  { %2879 = vst.msk [vmem:[%s4966_s12 + $0x18] sm:$0xf] %vm2878_vm6, %v3239_v45  ;;  %3811 = vpow2.f32 %v3225_v46  ;;  %v3226_v23 = vmul.f32 -1.442695, %v2704_v47 }
 0x56f   :  { %v3806_v51 = vpop.eup %3805 }
 0x570   :  { %v3243_v52 = vpack.c.bf16 %v3806_v51, %v3806_v51  ;;  %3813 = vpow2.f32 %v3226_v23 }
 0x572   :  { %2883 = vst.msk [vmem:[%s4966_s12 + $0x34] sm:$0xf] %vm2878_vm6, %v3243_v52 }
 0x577   :  { %v3808_v53 = vpop.eup %3807 }
 0x578   :  { %v2793_v54 = vadd.f32 1.0, %v3808_v53 }
 0x579   :  { %v3810_v11 = vpop.eup %3809 }
 0x57a   :  { %v2794_v55 = vadd.f32 1.0, %v3810_v11  ;;  %3815 = vrcp.f32 %v2793_v54 }
 0x57b   :  { %v3812_v56 = vpop.eup %3811 }
 0x57c   :  { %3817 = vrcp.f32 %v2794_v55  ;;  %v2800_v57 = vadd.f32 1.0, %v3812_v56 }
 0x57d   :  { %v3814_v58 = vpop.eup %3813 }
 0x57e   :  { %v2801_v59 = vadd.f32 1.0, %v3814_v58  ;;  %3819 = vrcp.f32 %v2800_v57 }
 0x580   :  { %3821 = vrcp.f32 %v2801_v59 }
 0x587   :  { %v3816_v60 = vpop.eup %3815 }
 0x589   :  { %v3818_v61 = vpop.eup %3817 }
 0x58a   :  { %v3238_v62 = vpack.c.bf16 %v3818_v61, %v3816_v60 }
 0x58b   :  { %v3820_v63 = vpop.eup %3819 }
 0x58c   :  { %2877 = vst [vmem:[%s4966_s12 + $0x10] sm:$0xff] %v3238_v62 }
 0x58d   :  { %v3822_v0 = vpop.eup %3821 }
 0x58e   :  { %v3242_v1 = vpack.c.bf16 %v3822_v0, %v3820_v63 }
 0x590   :  { %2882 = vst [vmem:[%s4966_s12 + $0x2c] sm:$0xff] %v3242_v1 }

</bundles_post_ra>
